<compile_context>
chip_gen: v5e
topology: v5e:2x2
jax: 0.10.0
libtpu: 0.0.40
codegen_flags: <defaults>
</compile_context>

<pallas_src>
import functools
import math

import jax
import jax.numpy as jnp
from jax.experimental import pallas as pl
from jax.experimental.pallas import tpu as pltpu


def _layernorm(x, gamma, beta, eps=1e-5):
    mu = jnp.mean(x, axis=-1, keepdims=True)
    xc = x - mu
    var = jnp.mean(xc * xc, axis=-1, keepdims=True)
    return xc * jax.lax.rsqrt(var + eps) * gamma + beta


def _heads_first(x3):
    """(rows, H, hd) -> (H, rows, hd) via the layout-aware TPU primitive."""
    if hasattr(pltpu, "einshape"):
        return pltpu.einshape("rhd->hrd", x3)
    return jnp.swapaxes(x3, 0, 1)


def _rows_first(x3):
    """(H, rows, hd) -> (rows, H, hd)."""
    if hasattr(pltpu, "einshape"):
        return pltpu.einshape("hrd->rhd", x3)
    return jnp.swapaxes(x3, 0, 1)


# Row indices of the packed (9, E) f32 parameter block.
_BQ, _BK, _BV, _BO, _B2, _G1, _BE1, _G2, _BE2 = range(9)


def encoder_layer_kernel(
    x_ref, xkv_ref,
    wq_ref, wk_ref, wv_ref, wo_ref, pvec_ref,
    w1_ref, b1_ref, w2_ref,
    o_ref,
    kh_ref, vh_ref, r1_ref, ff_ref,
    *, num_heads, cache_kv, approx_softmax,
):
    qi = pl.program_id(1)
    f = pl.program_id(2)
    nf = pl.num_programs(2)

    TQ, E = x_ref.shape[1], x_ref.shape[2]
    S = xkv_ref.shape[1]
    H = num_heads
    hd = E // H
    scale = 1.0 / math.sqrt(hd)

    # ---- K/V projection (heads-first), cached in VMEM scratch -------------
    # cache_kv: recompute only on the first grid step of each batch row.
    kv_now = ((qi == 0) & (f == 0)) if cache_kv else (f == 0)

    @pl.when(kv_now)
    def _project_kv():
        pv = pvec_ref[...]
        xkv = xkv_ref[0]                                        # (S, E) bf16
        k = jnp.dot(xkv, wk_ref[...],
                    preferred_element_type=jnp.float32) + pv[_BK:_BK + 1]
        v = jnp.dot(xkv, wv_ref[...],
                    preferred_element_type=jnp.float32) + pv[_BV:_BV + 1]
        kh_ref[...] = _heads_first(k.astype(jnp.bfloat16).reshape(S, H, hd))
        vh_ref[...] = _heads_first(v.astype(jnp.bfloat16).reshape(S, H, hd))

    # ---- attention + residual-1 LayerNorm: once per (b, q-tile) -----------
    @pl.when(f == 0)
    def _attention_and_ln1():
        pv = pvec_ref[...]
        xq = x_ref[0]                                           # (TQ, E) f32
        xq_bf = xq.astype(jnp.bfloat16)
        q = jnp.dot(xq_bf, wq_ref[...],
                    preferred_element_type=jnp.float32) + pv[_BQ:_BQ + 1]
        qh = _heads_first(q.astype(jnp.bfloat16).reshape(TQ, H, hd))  # (H,TQ,hd)

        # Scores: batched over heads, contraction expressed directly.
        s = jnp.einsum("hqd,hkd->hqk", qh, kh_ref[...],
                       preferred_element_type=jnp.float32) * scale   # (H,TQ,S)
        s = s - jnp.max(s, axis=-1, keepdims=True)
        p = jnp.exp(s)
        denom = jnp.sum(p, axis=-1, keepdims=True)
        if approx_softmax:
            p = p * pl.reciprocal(denom, approx=True)
        else:
            p = p / denom

        ctx = jnp.einsum("hqk,hkd->hqd", p.astype(jnp.bfloat16), vh_ref[...],
                         preferred_element_type=jnp.float32)         # (H,TQ,hd)
        # Single dense output projection: relayout ctx to (TQ, E) (cheap,
        # q_tile*E bf16) instead of a per-head matmul + sum over heads.
        ctx2 = _rows_first(ctx.astype(jnp.bfloat16)).reshape(TQ, E)
        attn = jnp.dot(ctx2, wo_ref[...],
                       preferred_element_type=jnp.float32) + pv[_BO:_BO + 1]

        # residual 1 + LayerNorm (dropout p -> identity)
        r1_ref[...] = _layernorm(xq + attn, pv[_G1:_G1 + 1], pv[_BE1:_BE1 + 1])
        ff_ref[...] = jnp.zeros_like(ff_ref)

    # ---- FFN: one f_tile slab of the hidden dimension per grid step -------
    r1_bf = r1_ref[...].astype(jnp.bfloat16)
    h1 = jnp.dot(r1_bf, w1_ref[...],
                 preferred_element_type=jnp.float32) + b1_ref[...]
    h1 = jnp.maximum(h1, 0.0).astype(jnp.bfloat16)
    ff_ref[...] += jnp.dot(h1, w2_ref[...], preferred_element_type=jnp.float32)

    # ---- finalize: residual 2 + LayerNorm, write the output tile ----------
    @pl.when(f == nf - 1)
    def _finalize():
        pv = pvec_ref[...]
        y = r1_ref[...] + ff_ref[...] + pv[_B2:_B2 + 1]
        o_ref[0] = _layernorm(y, pv[_G2:_G2 + 1],
                              pv[_BE2:_BE2 + 1]).astype(o_ref.dtype)


def _vmem_capacity_bytes():
    """Physical VMEM per core (narrow feature detection, not error masking)."""
    try:
        return int(pltpu.get_tpu_info().vmem_capacity_bytes)
    except Exception:
        return 128 << 20   # v5e/v6e default


def encoder_layer(x, params, *, num_heads, q_tile=None, f_tile=None,
                  approx_softmax=True):
    """x: (B, S, E) float32. params: dict of f32 weights (see init_params)."""
    B, S, E = x.shape
    if E % num_heads != 0:
        raise ValueError(f"embed_dim={E} not divisible by num_heads={num_heads}")
    F = params["w1"].shape[1]
    cap = _vmem_capacity_bytes()

    # --- tiling choices -----------------------------------------------------
    if q_tile is None:
        q_tile = S
        for cand in (256, 128, 64, 32, 16, 8):
            if cand <= S and S % cand == 0:
                q_tile = cand
                break
    assert S % q_tile == 0 and (q_tile == S or q_tile % 8 == 0)
    n_q = S // q_tile

    if f_tile is None:
        # Keep w1/w2 fully resident if they fit ~30% of VMEM, else stream.
        if 2 * E * F * 2 <= int(0.30 * cap) or F <= 128:
            f_tile = F
        else:
            f_tile = F
            for cand in (4096, 2048, 1024, 512, 256, 128):
                if cand < F and F % cand == 0:
                    f_tile = cand
                    break
    assert F % f_tile == 0 and (f_tile == F or f_tile % 128 == 0)
    n_f = F // f_tile

    # Cache K/V per batch row unless B==1 would leave a megacore idle.
    cache_kv = (B > 1) or (n_q == 1)

    # --- host-side parameter packing / casts --------------------------------
    pvec = jnp.concatenate(
        [params["bq"], params["bk"], params["bv"], params["bo"], params["b2"],
         params["g1"], params["be1"], params["g2"], params["be2"]], axis=0)  # (9,E)

    wq = params["wq"].astype(jnp.bfloat16)
    wk = params["wk"].astype(jnp.bfloat16)
    wv = params["wv"].astype(jnp.bfloat16)
    wo = params["wo"].astype(jnp.bfloat16)
    w1 = params["w1"].astype(jnp.bfloat16)
    w2 = params["w2"].astype(jnp.bfloat16)
    b1 = params["b1"]
    x_kv = x.astype(jnp.bfloat16)          # K/V rows pre-cast: halves the big DMA

    kernel = functools.partial(encoder_layer_kernel, num_heads=num_heads,
                               cache_kv=cache_kv, approx_softmax=approx_softmax)

    # --- advisory cost estimate (matches actual executed work) -------------
    flops = B * (8 * S * E * E + 4 * S * S * E + 4 * S * E * F)
    if not cache_kv:
        flops += B * (n_q - 1) * 4 * S * E * E
    transcendentals = B * num_heads * S * S + 4 * B * S
    const_w_bytes = 4 * E * E * 2 + pvec.size * 4
    ffn_bytes = (2 * E * F * 2 + F * 4) * (B * n_q if n_f > 1 else 1)
    bytes_accessed = B * S * E * (4 + 2 + 4) + const_w_bytes + ffn_bytes
    cost = pl.CostEstimate(flops=int(flops), transcendentals=int(transcendentals),
                           bytes_accessed=int(bytes_accessed))

    # --- generation-aware VMEM limit ----------------------------------------
    bf, f32 = 2, 4
    hd = E // num_heads
    resident = 2 * S * E * bf + 2 * q_tile * E * f32               # kv + r1/ff scratch
    pipelined = (4 * E * E * bf + pvec.size * f32                  # const weights
                 + q_tile * E * f32 + S * E * bf                   # x tile + x_kv
                 + (E * f_tile + f_tile * E) * bf + f_tile * f32   # w1/w2/b1 slabs
                 + q_tile * E * f32)                               # out tile
    temps = (2 * num_heads * q_tile * S * f32                      # scores / probs
             + num_heads * q_tile * hd * f32                       # ctx
             + q_tile * f_tile * f32                               # h1
             + 6 * q_tile * E * f32)
    est = resident + 2 * pipelined + temps
    vmem_limit = int(min(max(est + (8 << 20), 32 << 20), int(cap * 0.85)))

    # --- specs ---------------------------------------------------------------
    in_specs = [
        pl.BlockSpec((1, q_tile, E), lambda b, qi, f: (b, qi, 0)),   # x (f32 q rows)
        pl.BlockSpec((1, S, E),      lambda b, qi, f: (b, 0, 0)),    # x (bf16 K/V rows)
        pl.BlockSpec((E, E),         lambda b, qi, f: (0, 0)),       # wq
        pl.BlockSpec((E, E),         lambda b, qi, f: (0, 0)),       # wk
        pl.BlockSpec((E, E),         lambda b, qi, f: (0, 0)),       # wv
        pl.BlockSpec((E, E),         lambda b, qi, f: (0, 0)),       # wo
        pl.BlockSpec((9, E),         lambda b, qi, f: (0, 0)),       # packed biases/LN
        pl.BlockSpec((E, f_tile),    lambda b, qi, f: (0, f)),       # w1 slab
        pl.BlockSpec((1, f_tile),    lambda b, qi, f: (0, f)),       # b1 slab
        pl.BlockSpec((f_tile, E),    lambda b, qi, f: (f, 0)),       # w2 slab
    ]
    out_spec = pl.BlockSpec((1, q_tile, E), lambda b, qi, f: (b, qi, 0))
    scratch = [
        pltpu.VMEM((num_heads, S, hd), jnp.bfloat16),   # K heads-first cache
        pltpu.VMEM((num_heads, S, hd), jnp.bfloat16),   # V heads-first cache
        pltpu.VMEM((q_tile, E), jnp.float32),           # r1 (post-LN1 residual)
        pltpu.VMEM((q_tile, E), jnp.float32),           # FFN accumulator
    ]

    dim_sem = ("parallel", "arbitrary" if cache_kv else "parallel", "arbitrary")

    fn = pl.pallas_call(
        kernel,
        out_shape=jax.ShapeDtypeStruct((B, S, E), x.dtype),
        grid_spec=pltpu.PrefetchScalarGridSpec(
            num_scalar_prefetch=0,
            grid=(B, n_q, n_f),
            in_specs=in_specs,
            out_specs=out_spec,
            scratch_shapes=scratch,
        ),
        compiler_params=pltpu.CompilerParams(
            dimension_semantics=dim_sem,
            vmem_limit_bytes=vmem_limit,
        ),
        cost_estimate=cost,
    )
    return fn(x, x_kv, wq, wk, wv, wo, pvec, w1, b1, w2)


def init_params(key, embed_dim, feedforward_dim):
    """Deterministic synthetic parameter init (not a checkpoint load)."""
    ks = jax.random.split(key, 6)
    std = 0.02
    return {
        "wq": jax.random.normal(ks[0], (embed_dim, embed_dim), jnp.float32) * std,
        "wk": jax.random.normal(ks[1], (embed_dim, embed_dim), jnp.float32) * std,
        "wv": jax.random.normal(ks[2], (embed_dim, embed_dim), jnp.float32) * std,
        "wo": jax.random.normal(ks[3], (embed_dim, embed_dim), jnp.float32) * std,
        "w1": jax.random.normal(ks[4], (embed_dim, feedforward_dim), jnp.float32) * std,
        "w2": jax.random.normal(ks[5], (feedforward_dim, embed_dim), jnp.float32) * std,
        "bq": jnp.zeros((1, embed_dim), jnp.float32),
        "bk": jnp.zeros((1, embed_dim), jnp.float32),
        "bv": jnp.zeros((1, embed_dim), jnp.float32),
        "bo": jnp.zeros((1, embed_dim), jnp.float32),
        "b1": jnp.zeros((1, feedforward_dim), jnp.float32),
        "b2": jnp.zeros((1, embed_dim), jnp.float32),
        "g1": jnp.ones((1, embed_dim), jnp.float32),
        "be1": jnp.zeros((1, embed_dim), jnp.float32),
        "g2": jnp.ones((1, embed_dim), jnp.float32),
        "be2": jnp.zeros((1, embed_dim), jnp.float32),
    }


def reference(x, p, num_heads):
    """Pure-JAX f32 reference of the same forward pass (sanity check)."""
    B, S, E = x.shape
    hd = E // num_heads
    q = x @ p["wq"] + p["bq"]
    k = x @ p["wk"] + p["bk"]
    v = x @ p["wv"] + p["bv"]

    def split(t):
        return t.reshape(B, S, num_heads, hd).transpose(0, 2, 1, 3)

    qh, kh, vh = split(q), split(k), split(v)
    s = jnp.einsum("bhqd,bhkd->bhqk", qh, kh) / math.sqrt(hd)
    pattn = jax.nn.softmax(s, axis=-1)
    ctx = jnp.einsum("bhqk,bhkd->bhqd", pattn, vh)
    ctx = ctx.transpose(0, 2, 1, 3).reshape(B, S, E)
    attn_out = ctx @ p["wo"] + p["bo"]

    def ln(t, g, b):
        mu = jnp.mean(t, -1, keepdims=True)
        var = jnp.mean((t - mu) ** 2, -1, keepdims=True)
        return (t - mu) / jnp.sqrt(var + 1e-5) * g + b

    r1 = ln(x + attn_out, p["g1"], p["be1"])
    ff = jnp.maximum(r1 @ p["w1"] + p["b1"], 0.0) @ p["w2"] + p["b2"]
    return ln(r1 + ff, p["g2"], p["be2"])


if __name__ == "__main__":
    B, S, E, F, H = 2, 16, 32, 256, 4
    key = jax.random.PRNGKey(0)
    kx, kp = jax.random.split(key)
    x = jax.random.normal(kx, (B, S, E), jnp.float32)
    params = init_params(kp, E, F)

    # q_tile=8, f_tile=128 -> grid (B, 2, 2): exercises the K/V-caching,
    # r1-caching and FFN-streaming grid axes.
    out = encoder_layer(x, params, num_heads=H, q_tile=8, f_tile=128)
    out = jax.block_until_ready(out)

    ref = reference(x, params, H)
    assert out.shape == (B, S, E)
    err = float(jnp.max(jnp.abs(out - ref)))
    # bf16 MXU matmuls with f32 accumulation: bf16-appropriate tolerance.
    assert err < 5e-2, f"max abs err {err}"

    print("KERNEL_OK")
</pallas_src>

<mosaic_0001>
module attributes {stable_mosaic.version = 11 : i64} {
  func.func @encoder_layer_kernel(%arg0: i32, %arg1: i32, %arg2: i32, %arg3: memref<1x8x32xf32, #tpu.memory_space<vmem>>, %arg4: memref<1x16x32xbf16, #tpu.memory_space<vmem>>, %arg5: memref<32x32xbf16, #tpu.memory_space<vmem>>, %arg6: memref<32x32xbf16, #tpu.memory_space<vmem>>, %arg7: memref<32x32xbf16, #tpu.memory_space<vmem>>, %arg8: memref<32x32xbf16, #tpu.memory_space<vmem>>, %arg9: memref<9x32xf32, #tpu.memory_space<vmem>>, %arg10: memref<32x128xbf16, #tpu.memory_space<vmem>>, %arg11: memref<1x128xf32, #tpu.memory_space<vmem>>, %arg12: memref<128x32xbf16, #tpu.memory_space<vmem>>, %arg13: memref<1x8x32xf32, #tpu.memory_space<vmem>>, %arg14: memref<4x16x8xbf16, #tpu.memory_space<vmem>>, %arg15: memref<4x16x8xbf16, #tpu.memory_space<vmem>>, %arg16: memref<8x32xf32, #tpu.memory_space<vmem>>, %arg17: memref<8x32xf32, #tpu.memory_space<vmem>>) attributes {dimension_semantics = [#tpu.dimension_semantics<parallel>, #tpu.dimension_semantics<arbitrary>, #tpu.dimension_semantics<arbitrary>], iteration_bounds = array<i64: 2, 2, 2>, scalar_prefetch = 0 : i64, scratch_operands = 4 : i64, tpu.core_type = #tpu.core_type<tc>, window_params = [{transform_indices = @transform_0, window_bounds = array<i64: 1, 8, 32>}, {transform_indices = @transform_1, window_bounds = array<i64: 1, 16, 32>}, {pipeline_mode = #tpu.pipeline_mode<synchronous>, transform_indices = @transform_2, window_bounds = array<i64: 32, 32>}, {pipeline_mode = #tpu.pipeline_mode<synchronous>, transform_indices = @transform_3, window_bounds = array<i64: 32, 32>}, {pipeline_mode = #tpu.pipeline_mode<synchronous>, transform_indices = @transform_4, window_bounds = array<i64: 32, 32>}, {pipeline_mode = #tpu.pipeline_mode<synchronous>, transform_indices = @transform_5, window_bounds = array<i64: 32, 32>}, {pipeline_mode = #tpu.pipeline_mode<synchronous>, transform_indices = @transform_6, window_bounds = array<i64: 9, 32>}, {transform_indices = @transform_7, window_bounds = array<i64: 32, 128>}, {transform_indices = @transform_8, window_bounds = array<i64: 1, 128>}, {transform_indices = @transform_9, window_bounds = array<i64: 128, 32>}, {transform_indices = @transform_10, window_bounds = array<i64: 1, 8, 32>}]} {
    %c0_i32 = arith.constant 0 : i32
    %0 = arith.cmpi eq, %arg1, %c0_i32 : i32
    %c0_i32_0 = arith.constant 0 : i32
    %1 = arith.cmpi eq, %arg2, %c0_i32_0 : i32
    %2 = arith.andi %0, %1 : i1
    %3 = arith.extui %2 : i1 to i32
    %c0_i32_1 = arith.constant 0 : i32
    %4 = arith.cmpi ne, %3, %c0_i32_1 : i32
    scf.if %4 {
      %c0_18 = arith.constant 0 : index
      %c0_19 = arith.constant 0 : index
      %26 = vector.load %arg9[%c0_18, %c0_19] : memref<9x32xf32, #tpu.memory_space<vmem>>, vector<9x32xf32>
      %c0_20 = arith.constant 0 : index
      %c0_21 = arith.constant 0 : index
      %c0_22 = arith.constant 0 : index
      %27 = vector.load %arg4[%c0_20, %c0_21, %c0_22] : memref<1x16x32xbf16, #tpu.memory_space<vmem>>, vector<1x16x32xbf16>
      %28 = vector.shape_cast %27 : vector<1x16x32xbf16> to vector<16x32xbf16>
      %c0_23 = arith.constant 0 : index
      %c0_24 = arith.constant 0 : index
      %29 = vector.load %arg6[%c0_23, %c0_24] : memref<32x32xbf16, #tpu.memory_space<vmem>>, vector<32x32xbf16>
      %cst_25 = arith.constant dense<0.000000e+00> : vector<16x32xf32>
      %30 = tpu.matmul %28, %29, %cst_25 {dimension_numbers = #tpu.dot_dimension_numbers<[1], [0], [0], [1], [0, 0, 1, 1], [], []>} : vector<16x32xbf16>, vector<32x32xbf16>, vector<16x32xf32> -> vector<16x32xf32>
      %31 = vector.extract_strided_slice %26 {offsets = [1, 0], sizes = [1, 32], strides = [1, 1]} : vector<9x32xf32> to vector<1x32xf32>
      %32 = vector.broadcast %31 : vector<1x32xf32> to vector<16x32xf32>
      %33 = arith.addf %30, %32 : vector<16x32xf32>
      %c0_26 = arith.constant 0 : index
      %c0_27 = arith.constant 0 : index
      %34 = vector.load %arg7[%c0_26, %c0_27] : memref<32x32xbf16, #tpu.memory_space<vmem>>, vector<32x32xbf16>
      %cst_28 = arith.constant dense<0.000000e+00> : vector<16x32xf32>
      %35 = tpu.matmul %28, %34, %cst_28 {dimension_numbers = #tpu.dot_dimension_numbers<[1], [0], [0], [1], [0, 0, 1, 1], [], []>} : vector<16x32xbf16>, vector<32x32xbf16>, vector<16x32xf32> -> vector<16x32xf32>
      %36 = vector.extract_strided_slice %26 {offsets = [2, 0], sizes = [1, 32], strides = [1, 1]} : vector<9x32xf32> to vector<1x32xf32>
      %37 = vector.broadcast %36 : vector<1x32xf32> to vector<16x32xf32>
      %38 = arith.addf %35, %37 : vector<16x32xf32>
      %39 = arith.truncf %33 : vector<16x32xf32> to vector<16x32xbf16>
      %40 = vector.shape_cast %39 : vector<16x32xbf16> to vector<16x4x8xbf16>
      %41 = tpu.transpose %40, [1, 0, 2] : vector<16x4x8xbf16> -> vector<4x16x8xbf16>
      %c0_29 = arith.constant 0 : index
      %c0_30 = arith.constant 0 : index
      %c0_31 = arith.constant 0 : index
      %42 = vector.load %arg14[%c0_29, %c0_30, %c0_31] : memref<4x16x8xbf16, #tpu.memory_space<vmem>>, vector<4x16x8xbf16>
      tpu.vector_store %arg14[%c0_29, %c0_30, %c0_31], %41 {strides = array<i32>} : memref<4x16x8xbf16, #tpu.memory_space<vmem>>, vector<4x16x8xbf16>,
      %43 = arith.truncf %38 : vector<16x32xf32> to vector<16x32xbf16>
      %44 = vector.shape_cast %43 : vector<16x32xbf16> to vector<16x4x8xbf16>
      %45 = tpu.transpose %44, [1, 0, 2] : vector<16x4x8xbf16> -> vector<4x16x8xbf16>
      %c0_32 = arith.constant 0 : index
      %c0_33 = arith.constant 0 : index
      %c0_34 = arith.constant 0 : index
      %46 = vector.load %arg15[%c0_32, %c0_33, %c0_34] : memref<4x16x8xbf16, #tpu.memory_space<vmem>>, vector<4x16x8xbf16>
      tpu.vector_store %arg15[%c0_32, %c0_33, %c0_34], %45 {strides = array<i32>} : memref<4x16x8xbf16, #tpu.memory_space<vmem>>, vector<4x16x8xbf16>,
    } else {
    }
    %c0_i32_2 = arith.constant 0 : i32
    %5 = arith.cmpi eq, %arg2, %c0_i32_2 : i32
    %6 = arith.extui %5 : i1 to i32
    %c0_i32_3 = arith.constant 0 : i32
    %7 = arith.cmpi ne, %6, %c0_i32_3 : i32
    scf.if %7 {
      %c0_18 = arith.constant 0 : index
      %c0_19 = arith.constant 0 : index
      %26 = vector.load %arg9[%c0_18, %c0_19] : memref<9x32xf32, #tpu.memory_space<vmem>>, vector<9x32xf32>
      %c0_20 = arith.constant 0 : index
      %c0_21 = arith.constant 0 : index
      %c0_22 = arith.constant 0 : index
      %27 = vector.load %arg3[%c0_20, %c0_21, %c0_22] : memref<1x8x32xf32, #tpu.memory_space<vmem>>, vector<1x8x32xf32>
      %28 = vector.shape_cast %27 : vector<1x8x32xf32> to vector<8x32xf32>
      %29 = arith.truncf %28 : vector<8x32xf32> to vector<8x32xbf16>
      %c0_23 = arith.constant 0 : index
      %c0_24 = arith.constant 0 : index
      %30 = vector.load %arg5[%c0_23, %c0_24] : memref<32x32xbf16, #tpu.memory_space<vmem>>, vector<32x32xbf16>
      %cst_25 = arith.constant dense<0.000000e+00> : vector<8x32xf32>
      %31 = tpu.matmul %29, %30, %cst_25 {dimension_numbers = #tpu.dot_dimension_numbers<[1], [0], [0], [1], [0, 0, 1, 1], [], []>} : vector<8x32xbf16>, vector<32x32xbf16>, vector<8x32xf32> -> vector<8x32xf32>
      %32 = vector.extract_strided_slice %26 {offsets = [0, 0], sizes = [1, 32], strides = [1, 1]} : vector<9x32xf32> to vector<1x32xf32>
      %33 = vector.broadcast %32 : vector<1x32xf32> to vector<8x32xf32>
      %34 = arith.addf %31, %33 : vector<8x32xf32>
      %35 = arith.truncf %34 : vector<8x32xf32> to vector<8x32xbf16>
      %36 = vector.shape_cast %35 : vector<8x32xbf16> to vector<8x4x8xbf16>
      %37 = tpu.transpose %36, [1, 0, 2] : vector<8x4x8xbf16> -> vector<4x8x8xbf16>
      %c0_26 = arith.constant 0 : index
      %c0_27 = arith.constant 0 : index
      %c0_28 = arith.constant 0 : index
      %38 = vector.load %arg14[%c0_26, %c0_27, %c0_28] : memref<4x16x8xbf16, #tpu.memory_space<vmem>>, vector<4x16x8xbf16>
      "tpu.trace_start"() <{level = 10 : i32, message = "hqd,hkd->hqk"}> : () -> ()
      %cst_29 = arith.constant dense<0.000000e+00> : vector<4x8x16xf32>
      %39 = tpu.matmul %37, %38, %cst_29 {dimension_numbers = #tpu.dot_dimension_numbers<[2], [2], [1], [1], [0, 0, 0, 1, 1, 1], [0], [0]>} : vector<4x8x8xbf16>, vector<4x16x8xbf16>, vector<4x8x16xf32> -> vector<4x8x16xf32>
      "tpu.trace_stop"() : () -> ()
      %cst_30 = arith.constant 0.353553385 : f32
      %40 = vector.broadcast %cst_30 : f32 to vector<4x8x16xf32>
      %41 = arith.mulf %39, %40 : vector<4x8x16xf32>
      %cst_31 = arith.constant dense<0xFF800000> : vector<4x8xf32>
      %42 = vector.multi_reduction <maximumf>, %41, %cst_31 [2] : vector<4x8x16xf32> to vector<4x8xf32>
      %43 = vector.shape_cast %42 : vector<4x8xf32> to vector<4x8x1xf32>
      %44 = vector.broadcast %43 : vector<4x8x1xf32> to vector<4x8x16xf32>
      %45 = arith.subf %41, %44 : vector<4x8x16xf32>
      %46 = math.exp %45 : vector<4x8x16xf32>
      %cst_32 = arith.constant dense<0.000000e+00> : vector<4x8xf32>
      %47 = vector.multi_reduction <add>, %46, %cst_32 [2] : vector<4x8x16xf32> to vector<4x8xf32>
      %48 = vector.shape_cast %47 : vector<4x8xf32> to vector<4x8x1xf32>
      %49 = tpu.reciprocal %48 {approx = true} : vector<4x8x1xf32> -> vector<4x8x1xf32>
      %50 = vector.broadcast %49 : vector<4x8x1xf32> to vector<4x8x16xf32>
      %51 = arith.mulf %46, %50 : vector<4x8x16xf32>
      %52 = arith.truncf %51 : vector<4x8x16xf32> to vector<4x8x16xbf16>
      %c0_33 = arith.constant 0 : index
      %c0_34 = arith.constant 0 : index
      %c0_35 = arith.constant 0 : index
      %53 = vector.load %arg15[%c0_33, %c0_34, %c0_35] : memref<4x16x8xbf16, #tpu.memory_space<vmem>>, vector<4x16x8xbf16>
      "tpu.trace_start"() <{level = 10 : i32, message = "hqk,hkd->hqd"}> : () -> ()
      %cst_36 = arith.constant dense<0.000000e+00> : vector<4x8x8xf32>
      %54 = tpu.matmul %52, %53, %cst_36 {dimension_numbers = #tpu.dot_dimension_numbers<[2], [1], [1], [2], [0, 0, 0, 1, 1, 2], [0], [0]>} : vector<4x8x16xbf16>, vector<4x16x8xbf16>, vector<4x8x8xf32> -> vector<4x8x8xf32>
      "tpu.trace_stop"() : () -> ()
      %55 = arith.truncf %54 : vector<4x8x8xf32> to vector<4x8x8xbf16>
      %56 = tpu.transpose %55, [1, 0, 2] : vector<4x8x8xbf16> -> vector<8x4x8xbf16>
      %57 = vector.shape_cast %56 : vector<8x4x8xbf16> to vector<8x32xbf16>
      %c0_37 = arith.constant 0 : index
      %c0_38 = arith.constant 0 : index
      %58 = vector.load %arg8[%c0_37, %c0_38] : memref<32x32xbf16, #tpu.memory_space<vmem>>, vector<32x32xbf16>
      %cst_39 = arith.constant dense<0.000000e+00> : vector<8x32xf32>
      %59 = tpu.matmul %57, %58, %cst_39 {dimension_numbers = #tpu.dot_dimension_numbers<[1], [0], [0], [1], [0, 0, 1, 1], [], []>} : vector<8x32xbf16>, vector<32x32xbf16>, vector<8x32xf32> -> vector<8x32xf32>
      %60 = vector.extract_strided_slice %26 {offsets = [3, 0], sizes = [1, 32], strides = [1, 1]} : vector<9x32xf32> to vector<1x32xf32>
      %61 = vector.broadcast %60 : vector<1x32xf32> to vector<8x32xf32>
      %62 = arith.addf %59, %61 : vector<8x32xf32>
      %63 = arith.addf %28, %62 : vector<8x32xf32>
      %64 = vector.extract_strided_slice %26 {offsets = [5, 0], sizes = [1, 32], strides = [1, 1]} : vector<9x32xf32> to vector<1x32xf32>
      %65 = vector.extract_strided_slice %26 {offsets = [6, 0], sizes = [1, 32], strides = [1, 1]} : vector<9x32xf32> to vector<1x32xf32>
      %cst_40 = arith.constant dense<0.000000e+00> : vector<8xf32>
      %66 = vector.multi_reduction <add>, %63, %cst_40 [1] : vector<8x32xf32> to vector<8xf32>
      %67 = vector.shape_cast %66 : vector<8xf32> to vector<8x1xf32>
      %cst_41 = arith.constant 3.200000e+01 : f32
      %68 = vector.broadcast %cst_41 : f32 to vector<8x1xf32>
      %69 = arith.divf %67, %68 : vector<8x1xf32>
      %70 = vector.broadcast %69 : vector<8x1xf32> to vector<8x32xf32>
      %71 = arith.subf %63, %70 : vector<8x32xf32>
      %72 = arith.mulf %71, %71 : vector<8x32xf32>
      %cst_42 = arith.constant dense<0.000000e+00> : vector<8xf32>
      %73 = vector.multi_reduction <add>, %72, %cst_42 [1] : vector<8x32xf32> to vector<8xf32>
      %74 = vector.shape_cast %73 : vector<8xf32> to vector<8x1xf32>
      %cst_43 = arith.constant 3.200000e+01 : f32
      %75 = vector.broadcast %cst_43 : f32 to vector<8x1xf32>
      %76 = arith.divf %74, %75 : vector<8x1xf32>
      %cst_44 = arith.constant 9.99999974E-6 : f32
      %77 = vector.broadcast %cst_44 : f32 to vector<8x1xf32>
      %78 = arith.addf %76, %77 : vector<8x1xf32>
      %79 = math.rsqrt %78 : vector<8x1xf32>
      %80 = vector.broadcast %79 : vector<8x1xf32> to vector<8x32xf32>
      %81 = arith.mulf %71, %80 : vector<8x32xf32>
      %82 = vector.broadcast %64 : vector<1x32xf32> to vector<8x32xf32>
      %83 = arith.mulf %81, %82 : vector<8x32xf32>
      %84 = vector.broadcast %65 : vector<1x32xf32> to vector<8x32xf32>
      %85 = arith.addf %83, %84 : vector<8x32xf32>
      %c0_45 = arith.constant 0 : index
      %c0_46 = arith.constant 0 : index
      %86 = vector.load %arg16[%c0_45, %c0_46] : memref<8x32xf32, #tpu.memory_space<vmem>>, vector<8x32xf32>
      tpu.vector_store %arg16[%c0_45, %c0_46], %85 {strides = array<i32>} : memref<8x32xf32, #tpu.memory_space<vmem>>, vector<8x32xf32>,
      %cst_47 = arith.constant 0.000000e+00 : f32
      %87 = vector.broadcast %cst_47 : f32 to vector<8x32xf32>
      %c0_48 = arith.constant 0 : index
      %c0_49 = arith.constant 0 : index
      %88 = vector.load %arg17[%c0_48, %c0_49] : memref<8x32xf32, #tpu.memory_space<vmem>>, vector<8x32xf32>
      tpu.vector_store %arg17[%c0_48, %c0_49], %87 {strides = array<i32>} : memref<8x32xf32, #tpu.memory_space<vmem>>, vector<8x32xf32>,
    } else {
    }
    %c0 = arith.constant 0 : index
    %c0_4 = arith.constant 0 : index
    %8 = vector.load %arg16[%c0, %c0_4] : memref<8x32xf32, #tpu.memory_space<vmem>>, vector<8x32xf32>
    %9 = arith.truncf %8 : vector<8x32xf32> to vector<8x32xbf16>
    %c0_5 = arith.constant 0 : index
    %c0_6 = arith.constant 0 : index
    %10 = vector.load %arg10[%c0_5, %c0_6] : memref<32x128xbf16, #tpu.memory_space<vmem>>, vector<32x128xbf16>
    %cst = arith.constant dense<0.000000e+00> : vector<8x128xf32>
    %11 = tpu.matmul %9, %10, %cst {dimension_numbers = #tpu.dot_dimension_numbers<[1], [0], [0], [1], [0, 0, 1, 1], [], []>} : vector<8x32xbf16>, vector<32x128xbf16>, vector<8x128xf32> -> vector<8x128xf32>
    %c0_7 = arith.constant 0 : index
    %c0_8 = arith.constant 0 : index
    %12 = vector.load %arg11[%c0_7, %c0_8] : memref<1x128xf32, #tpu.memory_space<vmem>>, vector<1x128xf32>
    %13 = vector.broadcast %12 : vector<1x128xf32> to vector<8x128xf32>
    %14 = arith.addf %11, %13 : vector<8x128xf32>
    %cst_9 = arith.constant 0.000000e+00 : f32
    %15 = vector.broadcast %cst_9 : f32 to vector<8x128xf32>
    %16 = arith.maximumf %14, %15 : vector<8x128xf32>
    %17 = arith.truncf %16 : vector<8x128xf32> to vector<8x128xbf16>
    %c0_10 = arith.constant 0 : index
    %c0_11 = arith.constant 0 : index
    %18 = vector.load %arg17[%c0_10, %c0_11] : memref<8x32xf32, #tpu.memory_space<vmem>>, vector<8x32xf32>
    %c0_12 = arith.constant 0 : index
    %c0_13 = arith.constant 0 : index
    %19 = vector.load %arg12[%c0_12, %c0_13] : memref<128x32xbf16, #tpu.memory_space<vmem>>, vector<128x32xbf16>
    %cst_14 = arith.constant dense<0.000000e+00> : vector<8x32xf32>
    %20 = tpu.matmul %17, %19, %cst_14 {dimension_numbers = #tpu.dot_dimension_numbers<[1], [0], [0], [1], [0, 0, 1, 1], [], []>} : vector<8x128xbf16>, vector<128x32xbf16>, vector<8x32xf32> -> vector<8x32xf32>
    %21 = arith.addf %18, %20 : vector<8x32xf32>
    %c0_15 = arith.constant 0 : index
    %c0_16 = arith.constant 0 : index
    %22 = vector.load %arg17[%c0_15, %c0_16] : memref<8x32xf32, #tpu.memory_space<vmem>>, vector<8x32xf32>
    tpu.vector_store %arg17[%c0_15, %c0_16], %21 {strides = array<i32>} : memref<8x32xf32, #tpu.memory_space<vmem>>, vector<8x32xf32>,
    %c1_i32 = arith.constant 1 : i32
    %23 = arith.cmpi eq, %arg2, %c1_i32 : i32
    %24 = arith.extui %23 : i1 to i32
    %c0_i32_17 = arith.constant 0 : i32
    %25 = arith.cmpi ne, %24, %c0_i32_17 : i32
    scf.if %25 {
      %c0_18 = arith.constant 0 : index
      %c0_19 = arith.constant 0 : index
      %26 = vector.load %arg9[%c0_18, %c0_19] : memref<9x32xf32, #tpu.memory_space<vmem>>, vector<9x32xf32>
      %c0_20 = arith.constant 0 : index
      %c0_21 = arith.constant 0 : index
      %27 = vector.load %arg16[%c0_20, %c0_21] : memref<8x32xf32, #tpu.memory_space<vmem>>, vector<8x32xf32>
      %c0_22 = arith.constant 0 : index
      %c0_23 = arith.constant 0 : index
      %28 = vector.load %arg17[%c0_22, %c0_23] : memref<8x32xf32, #tpu.memory_space<vmem>>, vector<8x32xf32>
      %29 = arith.addf %27, %28 : vector<8x32xf32>
      %30 = vector.extract_strided_slice %26 {offsets = [4, 0], sizes = [1, 32], strides = [1, 1]} : vector<9x32xf32> to vector<1x32xf32>
      %31 = vector.broadcast %30 : vector<1x32xf32> to vector<8x32xf32>
      %32 = arith.addf %29, %31 : vector<8x32xf32>
      %33 = vector.extract_strided_slice %26 {offsets = [7, 0], sizes = [1, 32], strides = [1, 1]} : vector<9x32xf32> to vector<1x32xf32>
      %34 = vector.extract_strided_slice %26 {offsets = [8, 0], sizes = [1, 32], strides = [1, 1]} : vector<9x32xf32> to vector<1x32xf32>
      %cst_24 = arith.constant dense<0.000000e+00> : vector<8xf32>
      %35 = vector.multi_reduction <add>, %32, %cst_24 [1] : vector<8x32xf32> to vector<8xf32>
      %36 = vector.shape_cast %35 : vector<8xf32> to vector<8x1xf32>
      %cst_25 = arith.constant 3.200000e+01 : f32
      %37 = vector.broadcast %cst_25 : f32 to vector<8x1xf32>
      %38 = arith.divf %36, %37 : vector<8x1xf32>
      %39 = vector.broadcast %38 : vector<8x1xf32> to vector<8x32xf32>
      %40 = arith.subf %32, %39 : vector<8x32xf32>
      %41 = arith.mulf %40, %40 : vector<8x32xf32>
      %cst_26 = arith.constant dense<0.000000e+00> : vector<8xf32>
      %42 = vector.multi_reduction <add>, %41, %cst_26 [1] : vector<8x32xf32> to vector<8xf32>
      %43 = vector.shape_cast %42 : vector<8xf32> to vector<8x1xf32>
      %cst_27 = arith.constant 3.200000e+01 : f32
      %44 = vector.broadcast %cst_27 : f32 to vector<8x1xf32>
      %45 = arith.divf %43, %44 : vector<8x1xf32>
      %cst_28 = arith.constant 9.99999974E-6 : f32
      %46 = vector.broadcast %cst_28 : f32 to vector<8x1xf32>
      %47 = arith.addf %45, %46 : vector<8x1xf32>
      %48 = math.rsqrt %47 : vector<8x1xf32>
      %49 = vector.broadcast %48 : vector<8x1xf32> to vector<8x32xf32>
      %50 = arith.mulf %40, %49 : vector<8x32xf32>
      %51 = vector.broadcast %33 : vector<1x32xf32> to vector<8x32xf32>
      %52 = arith.mulf %50, %51 : vector<8x32xf32>
      %53 = vector.broadcast %34 : vector<1x32xf32> to vector<8x32xf32>
      %54 = arith.addf %52, %53 : vector<8x32xf32>
      %c0_29 = arith.constant 0 : index
      %c0_30 = arith.constant 0 : index
      %c0_31 = arith.constant 0 : index
      %55 = vector.load %arg13[%c0_29, %c0_30, %c0_31] : memref<1x8x32xf32, #tpu.memory_space<vmem>>, vector<1x8x32xf32>
      %56 = vector.shape_cast %55 : vector<1x8x32xf32> to vector<8x32xf32>
      %57 = vector.shape_cast %54 : vector<8x32xf32> to vector<1x8x32xf32>
      tpu.vector_store %arg13[%c0_29, %c0_30, %c0_31], %57 {strides = array<i32>} : memref<1x8x32xf32, #tpu.memory_space<vmem>>, vector<1x8x32xf32>,
    } else {
    }
    return
  }
  func.func @transform_0(%arg0: i32, %arg1: i32, %arg2: i32) -> (i32, i32, i32) {
    %c0_i32 = arith.constant 0 : i32
    %c0_i32_0 = arith.constant 0 : i32
    return %arg0, %arg1, %c0_i32 : i32, i32, i32
  }
  func.func @transform_1(%arg0: i32, %arg1: i32, %arg2: i32) -> (i32, i32, i32) {
    %c0_i32 = arith.constant 0 : i32
    %c0_i32_0 = arith.constant 0 : i32
    %c0_i32_1 = arith.constant 0 : i32
    return %arg0, %c0_i32, %c0_i32_0 : i32, i32, i32
  }
  func.func @transform_2(%arg0: i32, %arg1: i32, %arg2: i32) -> (i32, i32) {
    %c0_i32 = arith.constant 0 : i32
    %c0_i32_0 = arith.constant 0 : i32
    %c0_i32_1 = arith.constant 0 : i32
    return %c0_i32, %c0_i32_0 : i32, i32
  }
  func.func @transform_3(%arg0: i32, %arg1: i32, %arg2: i32) -> (i32, i32) {
    %c0_i32 = arith.constant 0 : i32
    %c0_i32_0 = arith.constant 0 : i32
    %c0_i32_1 = arith.constant 0 : i32
    return %c0_i32, %c0_i32_0 : i32, i32
  }
  func.func @transform_4(%arg0: i32, %arg1: i32, %arg2: i32) -> (i32, i32) {
    %c0_i32 = arith.constant 0 : i32
    %c0_i32_0 = arith.constant 0 : i32
    %c0_i32_1 = arith.constant 0 : i32
    return %c0_i32, %c0_i32_0 : i32, i32
  }
  func.func @transform_5(%arg0: i32, %arg1: i32, %arg2: i32) -> (i32, i32) {
    %c0_i32 = arith.constant 0 : i32
    %c0_i32_0 = arith.constant 0 : i32
    %c0_i32_1 = arith.constant 0 : i32
    return %c0_i32, %c0_i32_0 : i32, i32
  }
  func.func @transform_6(%arg0: i32, %arg1: i32, %arg2: i32) -> (i32, i32) {
    %c0_i32 = arith.constant 0 : i32
    %c0_i32_0 = arith.constant 0 : i32
    %c0_i32_1 = arith.constant 0 : i32
    return %c0_i32, %c0_i32_0 : i32, i32
  }
  func.func @transform_7(%arg0: i32, %arg1: i32, %arg2: i32) -> (i32, i32) {
    %c0_i32 = arith.constant 0 : i32
    %c0_i32_0 = arith.constant 0 : i32
    return %c0_i32, %arg2 : i32, i32
  }
  func.func @transform_8(%arg0: i32, %arg1: i32, %arg2: i32) -> (i32, i32) {
    %c0_i32 = arith.constant 0 : i32
    %c0_i32_0 = arith.constant 0 : i32
    return %c0_i32, %arg2 : i32, i32
  }
  func.func @transform_9(%arg0: i32, %arg1: i32, %arg2: i32) -> (i32, i32) {
    %c0_i32 = arith.constant 0 : i32
    %c0_i32_0 = arith.constant 0 : i32
    return %arg2, %c0_i32 : i32, i32
  }
  func.func @transform_10(%arg0: i32, %arg1: i32, %arg2: i32) -> (i32, i32, i32) {
    %c0_i32 = arith.constant 0 : i32
    %c0_i32_0 = arith.constant 0 : i32
    return %arg0, %arg1, %c0_i32 : i32, i32, i32
  }
}

</mosaic_0001>

<bundles_post_ra>
// kernel: tpu_custom_call.1
= control target key start
LH: loop header
LB: loop body
LE: loop exit
PB: predicated region body
PF: predicated region fallthrough
CT: control target
= control target key end

     0   :  { %s3145_s0 = inlined_call_operand.vmem [shape: f32[2,16,32], index: 0, kind: input, shape index: {}]   ;;  %s3146_s1 = inlined_call_operand.vmem [shape: bf16[2,16,32], index: 1, kind: input, shape index: {}]   ;;  %s3147_s2 = inlined_call_operand.vmem [shape: bf16[32,32], index: 2, kind: input, shape index: {}]   ;;  %s3148_s3 = inlined_call_operand.vmem [shape: bf16[32,32], index: 3, kind: input, shape index: {}]   ;;  %s3149_s4 = inlined_call_operand.vmem [shape: bf16[32,32], index: 4, kind: input, shape index: {}]   ;;  %s3150_s5 = inlined_call_operand.vmem [shape: bf16[32,32], index: 5, kind: input, shape index: {}]   ;;  %s3151_s6 = inlined_call_operand.vmem [shape: f32[9,32], index: 6, kind: input, shape index: {}]   ;;  %s3152_s7 = inlined_call_operand.vmem [shape: bf16[32,256], index: 7, kind: input, shape index: {}]   ;;  %s3153_s8 = inlined_call_operand.vmem [shape: f32[1,256], index: 8, kind: input, shape index: {}]   ;;  %s3154_s9 = inlined_call_operand.vmem [shape: bf16[256,32], index: 9, kind: input, shape index: {}]   ;;  %s3155_s10 = inlined_call_operand.hbm [shape: f32[2,16,32], index: 10, kind: output, shape index: {}]  }
   0x1   :  { %3170 = sst [smem:[#allocation21_spill]] %s3145_s0 }
   0x2   :  { %3171 = sst [smem:[#allocation22_spill]] %s3147_s2 }
   0x3   :  { %3172 = sst [smem:[#allocation23_spill]] %s3150_s5 }
   0x4   :  { %3173 = sst [smem:[#allocation24_spill]] %s3151_s6 }
   0x5   :  { %3174 = sst [smem:[#allocation25_spill]] %s3152_s7 }
   0x6   :  { %3175 = sst [smem:[#allocation26_spill]] %s3155_s10 }
   0x7   :  { %15 = vsyncpa [#allocation8], 0 }
   0x8   :  { %17 = vsyncpa [#allocation8 + $0x1], 0  ;;  %s2581_s13 = smov 0   ;;  %s2583_s14 = smov 0  }
   0x9   :  { %s2585_s15 = smov 0   ;;  %s2587_s16 = smov 0  }
   0xa   :  { %s2589_s17 = smov 0   ;;  %s2591_s18 = smov 0  }
   0xb   :  { %s2593_s19 = smov 0   ;;  %s2595_s20 = smov 0  }
   0xc   :  { %s2597_s21 = smov 0   ;;  %s2599_s22 = smov 0  }
   0xd   :  { %s2601_s23 = smov 0   ;;  %s2603_s24 = smov 0  }
   0xe LB: > { %3176 = sst [smem:[#allocation10_spill]] %s2472_s15  ;;  %s2066_s25 = sadd.s32 4294967295, %s2508_s24   ;;  %s2508_s24 = sphi %s2603_s24, %s23_s24   ;;  %s2504_s23 = sphi %s2601_s23, %s3209_s23   ;;  %s2500_s22 = sphi %s2599_s22, %s3208_s22   ;;  %s2496_s21 = sphi %s2597_s21, %s3207_s21   ;;  %s2492_s20 = sphi %s2595_s20, %s3206_s20   ;;  %s2488_s19 = sphi %s2593_s19, %s3205_s19   ;;  %s2484_s18 = sphi %s2591_s18, %s3204_s18   ;;  %s2480_s17 = sphi %s2589_s17, %s3203_s17   ;;  %s2476_s16 = sphi %s2587_s16, %s3202_s16   ;;  %s2472_s15 = sphi %s2585_s15, %s3201_s15   ;;  %s2468_s14 = sphi %s2583_s14, %s3211_s14   ;;  %s2464_s13 = sphi %s2581_s13, %s3210_s13  }
   0xf   : > { %3177 = sst [smem:[#allocation11_spill]] %s2480_s17  ;;  %s2067_s26 = sadd.s32 4294967294, %s2508_s24  }
  0x10   : > { %3178 = sst [smem:[#allocation12_spill]] %s2496_s21  ;;  %s35_s27 = sadd.s32 1, %s2496_s21 }
  0x11   : > { %3179 = sst [smem:[#allocation13_spill]] %s2500_s22  ;;  %p36_p0 = scmp.ge.s32.totalorder %s35_s27, 2 }
  0x12   : > { %3180 = sst [smem:[#allocation14_spill]] %s2504_s23  ;;  %s38_s28 = sadd.s32 1, %s2500_s22 }
  0x13   : > { %s42_s29 = sadd.s32 1, %s2504_s23  ;;  %p215_p1 = scmp.ne.s32.totalorder %s2480_s17, %s2476_s16 }
  0x14   : > { %s3213_s27 = smov (%p36_p0, %s35_s27), 0  ;;  %s3215_s28 = smov (!%p36_p0, %s38_s28), %s2500_s22 }
  0x15   : > { %3181 = sst [smem:[#allocation15_spill]] %s3213_s27  ;;  %s205_s30 = ssub.s32 %s2496_s21, %s3213_s27 }
  0x16   : > { %p216_p2 = scmp.eq.s32.totalorder %s2508_s24, 0  ;;  %p40_p3 = scmp.ge.s32.totalorder %s3215_s28, 2 }
  0x17   : > { %p206_p4 = scmp.eq.s32.totalorder %s205_s30, 0  ;;  %s208_s11 = sadd.s32 1, %s2480_s17 }
  0x18   : > { %p2655_p5 = por %p216_p2, %p215_p1  ;;  %s3217_s28 = smov (%p40_p3, %s3215_s28), 0 }
  0x19   : > { %3183 = sst [smem:[#allocation16_spill]] %s3217_s28  ;;  %s3219_s29 = smov (!%p40_p3, %s42_s29), %s2504_s23 }
  0x1a   : > { %s2663_s10 = scalar_select %p206_p4, %s2480_s17, %s208_s11  }
  0x1b   : > { %p44_p6 = scmp.ge.s32.totalorder %s3219_s29, 2  ;;  %s284_s5 = ssub.s32 %s2500_s22, %s3217_s28 }
  0x1c   : > { %3184 = sst [smem:[#allocation17_spill]] %s2663_s10  ;;  %p298_p7 = scmp.ne.s32.totalorder %s2472_s15, %s2468_s14 }
  0x1d   : > { %p299_p8 = scmp.eq.s32.totalorder %s2066_s25, 7  ;;  %s3221_s29 = smov (%p44_p6, %s3219_s29), 0 }
  0x1e   : > { %3185 = sst [smem:[#allocation18_spill]] %s3221_s29  ;;  %p304_p10 = scmp.ne.s32.totalorder %s2468_s14, %s2464_s13 }
  0x1f   : > { %p2671_p9 = por %p299_p8, %p298_p7  ;;  %s283_s27 = ssub.s32 %s2504_s23, %s3221_s29 }
  0x20   : > { %p305_p11 = scmp.eq.s32.totalorder %s2067_s26, 7  ;;  %s285_s2 = sor.u32 %s284_s5, %s283_s27 }
  0x21   : > { %s288_s6 = sadd.s32 1, %s2472_s15  ;;  %p286_p12 = scmp.eq.s32.totalorder %s285_s2, 0 }
  0x22   : > { %p2680_p13 = por %p305_p11, %p304_p10  ;;  %p2069_p0 = scmp.ge.s32.totalorder %s2508_s24, 8 }
  0x23   : > { %s2685_s28 = scalar_select %p286_p12, %s2472_s15, %s288_s6  }
  0x24   : > { %s3187_s11 = scalar_select %p2680_p13, 1, 0 }
  0x25   : > { %3189 = sst [smem:[#allocation20_spill]] %s2685_s28  ;;  %336 = sbr.rel (%p2069_p0) target bundleno = 56 (0x38), region = 36 }
  0x26   : > { %3188 = sst [smem:[#allocation19_spill]] %s3187_s11 }
  0x2a   : > { %358 = sbr.rel (!%p2655_p5) target bundleno = 56 (0x38), region = 48  ;;  %s360_s25 = sand.u32 (%p2655_p5), 1, %s2480_s17  }
  0x2b   : > { %s2071_s29 = sshll.u32 (%p2655_p5), %s2496_s21, 2  ;;  %s2070_s26 = sshll.u32 (%p2655_p5), %s360_s25, 4 }
  0x2c   : > { %s3190_s7 = sld [smem:[#allocation25_spill]] (%p2655_p5)  ;;  %s362_s23 = scalar_lea.vmem (%p2655_p5), [#allocation6], %s2070_s26 }
  0x32   : > { %s364_s2 = scalar_lea.vmem %s3190_s7, %s2071_s29 }
  0x33   : > { %v381_v0 = vld [vmem:[%s364_s2] sm:$0xf]  ;;  %v383_v1 = vld [vmem:[%s364_s2 + $0x8] sm:$0xf]  ;;  %v385_v2 = vld [vmem:[%s364_s2 + $0x10] sm:$0xf] }
  0x34   : > { %382 = vst [vmem:[%s362_s23] sm:$0xf] %v381_v0  ;;  %v387_v3 = vld [vmem:[%s364_s2 + $0x18] sm:$0xf] }
  0x35   : > { %384 = vst [vmem:[%s362_s23 + $0x4] sm:$0xf] %v383_v1 }
  0x36   : > { %386 = vst [vmem:[%s362_s23 + $0x8] sm:$0xf] %v385_v2 }
  0x37   : > { %388 = vst [vmem:[%s362_s23 + $0xc] sm:$0xf] %v387_v3 }
  0x38 PF: > { %p2072_p1 = scmp.ge.s32.totalorder %s2508_s24, 1  ;;  %p434_p2 = scmp.lt.s32.totalorder %s2508_s24, 9 }
  0x3a   : > { %p435_p3 = pnand %p2072_p1, %p434_p2 }
  0x3b   : > { %s441_s6 = sand.u32 (!%p435_p3), 1, %s2476_s16   ;;  %s3166_s29 = sand.u32 (!%p435_p3), 1, %s2468_s14  }
  0x3c   : > { %438 = sbr.rel (%p435_p3) target bundleno = 2373 (0x945), region = 97  ;;  %s2699_s23 = sshll.u32 (!%p435_p3), %s441_s6, 4 }
  0x3d   : > { %s2703_s12 = sshll.u32 (!%p435_p3), %s3166_s29, 3  ;;  %p499_p4 = scmp.lt.s32.totalorder (!%p435_p3), %s2492_s20, 1 }
  0x3e   : > { %p501_p5 = scmp.lt.s32.totalorder (!%p435_p3), %s2488_s19, 1  ;;  %p512_p6 = scmp.lt.s32.totalorder (!%p435_p3), %s2484_s18, 1 }
  0x3f   : > { %s2079_s25 = sshll.u32 (!%p435_p3), %s2484_s18, 4  ;;  %s3191_s0 = sld [smem:[#allocation21_spill]] (!%p435_p3) }
  0x40   : > { %p516_p7 = scmp.lt.s32.totalorder (!%p435_p3), %s2079_s25, 31  ;;  %p522_p8 = scmp.eq.s32.totalorder (!%p435_p3), %s2488_s19, 0 }
  0x41   : > { %s500_s26 = scalar_select %p499_p4, %s2492_s20, 1 }
  0x42   : > { %s502_s5 = scalar_select %p501_p5, %s2488_s19, 1 }
  0x43   : > { %s2075_s27 = sshll.u32 %s500_s26, 1  ;;  %s2209_s2 = sshll.u32 %s500_s26, 3 }
  0x44   : > { %s504_s16 = sadd.s32 %s2075_s27, %s502_s5  ;;  %s511_s6 = scalar_lea.vmem %s3146_s1, %s2209_s2 }
  0x45   : > { %s2076_s21 = sshll.u32 %s504_s16, 3  ;;  %s3223_s25 = smov (!%p516_p7, %s2079_s25), 31 }
  0x46   : > { %s2717_s17 = scalar_lea.vmem %s3191_s0, %s2076_s21  ;;  %p523_p10 = scmp.eq.s32.totalorder %s2484_s18, 0 }
  0x47   : > { %s2721_s28 = scalar_select %p512_p6, %s2484_s18, 1 }
  0x48   : > { %s2080_s5 = sshll.u32 %s3223_s25, 2  ;;  %p524_p11 = pnand %p523_p10, %p522_p8 }
  0x49   : > { %s514_s26 = scalar_lea.vmem %s3153_s8, %s2721_s28  ;;  %s2731_s27 = scalar_lea.vmem %s3154_s9, %s2080_s5 }
  0x4a   : > { %s443_s10 = scalar_lea.vmem [#allocation6], %s2699_s23  ;;  %s498_s21 = scalar_lea.vmem [#allocation7], %s2703_s12 }
  0x4b   : > { %527 = sbr.rel (%p524_p11) target bundleno = 409 (0x199), region = 105  ;;  %s3192_s0 = sld [smem:[#allocation24_spill]] (!%p524_p11) }
  0x4c   : > { %s2510_s29 = smov (!%p524_p11), 120   ;;  %s2512_s2 = smov (!%p524_p11), 104  }
  0x50   : > { %v2212_v4 = vld [vmem:[%s3148_s3 + $0x8] sm:$0xff]  ;;  %v2211_v6 = vld [vmem:[%s3148_s3] sm:$0xff]  ;;  %vm553_vm0 = vcmask 261120   ;;  %v2513_v26 = vmov 1983009808   ;;  %vm653_vm1 = vcmask 1047556  }
  0x51   : > { %v2214_v5 = vld [vmem:[%s3149_s4 + $0x8] sm:$0xff]  ;;  %563 = vmatpush.bf16.msra.mxu0 %v2212_v4  ;;  %v2213_v7 = vld [vmem:[%s3149_s4] sm:$0xff]  ;;  %v644_v27 = vunpack.c.l.s4 %v2513_v26  ;;  %v2514_v40 = vmov 1934713408   ;;  %vm855_vm2 = vcmask 60416  }
  0x52   : > { %594 = vmatpush.bf16.msra.mxu1 %v2214_v5  ;;  %v2210_v8 = vld [vmem:[%s511_s6] sm:$0xff]  ;;  %s2511_s6 = smov 112   ;;  %v658_v41 = vunpack.c.l.s4 %v2514_v40 }
  0x53   : > { %v528_v9 = vld [vmem:[%s3192_s0] sm:$0xff]  ;;  %v2762_v34 = vunpack.c.0.s8 %v644_v27 }
  0x54   : > { %v535_v10 = vperm.slane %v528_v9, 1  ;;  %v575_v11 = vperm.slane %v528_v9, 2  ;;  %v2772_v51 = vunpack.c.0.s8 %v658_v41 }
  0x55   : > { %564 = vmatpush.bf16.msra.mxu0 %v2211_v6 }
  0x56   : > { %595 = vmatpush.bf16.msra.mxu1 %v2213_v7 }
  0x58   : > { %2093 = vmatmul.msk.bf16.vlgmr.msra.gmra.mxu0 %vm553_vm0, %v2210_v8 }
  0x59   : > { %2102 = vmatmul.msk.bf16.vlgmr.msra.gmra.mxu1 %vm553_vm0, %v2210_v8 }
  0xd5   : > { %v566_v12 = vpop.f32.mrf.mxu0 }
  0xd6   : > { %v597_v13 = vpop.f32.mrf.mxu1  ;;  %v567_v14 = vadd.f32 %v566_v12, %v535_v10 }
  0xd7   : > { %v598_v15 = vadd.f32 %v597_v13, %v575_v11 }
  0xd8   : > { %v602_v16 = vpack.c.bf16 %v567_v14, %v567_v14 }
  0xd9   : > { %v864_v17 = vpack.c.bf16 %v598_v15, %v598_v15 }
  0xda   : > { %610 = vrot.lane.b32.xlu2 %v602_v16, %s2511_s6  ;;  %606 = vrot.lane.b32.xlu0 %v602_v16, %s2510_s29  ;;  %v621_v33 = vshrl.u32 %v602_v16, 16 }
  0xdb   : > { %868 = vrot.lane.b32.xlu1 %v864_v17, %s2510_s29  ;;  %v883_v36 = vshrl.u32 %v864_v17, 16 }
  0xdd   : > { %v568_v21 = vpop.f32.mrf.mxu0 }
  0xde   : > { %v599_v18 = vpop.f32.mrf.mxu1  ;;  %v569_v22 = vadd.f32 %v568_v21, %v535_v10 }
  0xdf   : > { %v600_v19 = vadd.f32 %v599_v18, %v575_v11 }
  0xe0   : > { %v2753_v23 = vpack.c.bf16 %v569_v22, %v569_v22 }
  0xe1   : > { %v2750_v20 = vpack.c.bf16 %v600_v19, %v600_v19 }
  0xe2   : > { %872 = vrot.lane.b32.xlu2 %v864_v17, %s2511_s6  ;;  %614 = vrot.lane.b32.xlu0 %v602_v16, %s2512_s2  ;;  %v633_v60 = vshrl.u32 %v2753_v23, 16 }
  0xe3   : > { %870 = vrot.lane.b32.xlu1 %v2750_v20, %s2510_s29  ;;  %v895_v54 = vshrl.u32 %v2750_v20, 16 }
  0xea   : > { %612 = vrot.lane.b32.xlu2 %v2753_v23, %s2511_s6  ;;  %608 = vrot.lane.b32.xlu0 %v2753_v23, %s2510_s29 }
  0xeb   : > { %616 = vrot.lane.b32.xlu1 %v2753_v23, %s2512_s2 }
  0xf2   : > { %878 = vrot.lane.b32.xlu2 %v2750_v20, %s2512_s2  ;;  %874 = vrot.lane.b32.xlu0 %v2750_v20, %s2511_s6 }
  0xf3   : > { %876 = vrot.lane.b32.xlu1 %v864_v17, %s2512_s2 }
 0x134   : > { %v611_v24 = vpop.permute.xlu2 %610 }
 0x135   : > { %v627_v46 = vshrl.u32 %v611_v24, 16 }
 0x13c   : > { %v2760_v25 = vpop.permute.xlu2 %872 }
 0x13d   : > { %v889_v57 = vshrl.u32 %v2760_v25, 16 }
 0x144   : > { %v613_v30 = vpop.permute.xlu2 %612 }
 0x145   : > { %v639_v58 = vshrl.u32 %v613_v30, 16 }
 0x14c   : > { %v607_v29 = vpop.permute.xlu0 %606  ;;  %v2774_v52 = vpop.permute.xlu2 %878 }
 0x14d   : > { %v869_v28 = vpop.permute.xlu1 %868  ;;  %v622_v31 = vshrl.u32 %v607_v29, 16  ;;  %v620_v35 = vpack.i.b16 %v607_v29, %v602_v16  ;;  %v902_v3 = vshrl.u32 %v2774_v52, 16 }
 0x14e   : > { %v884_v32 = vshrl.u32 %v869_v28, 16  ;;  %v882_v38 = vpack.i.b16 %v869_v28, %v864_v17 }
 0x14f   : > { %v623_v37 = vpack.i.b16 %v622_v31, %v621_v33  ;;  %v646_v42 = vperm.slane %v620_v35, %v2762_v34 }
 0x150   : > { %v885_v39 = vpack.i.b16 %v884_v32, %v883_v36  ;;  %v2767_v49 = vperm.slane %v882_v38, %v2762_v34 }
 0x151   : > { %v673_v44 = vperm.slane %v623_v37, %v2762_v34  ;;  %v655_v53 = vrot.slane %v646_v42, 4 }
 0x152   : > { %v2770_v50 = vperm.slane %v885_v39, %v2762_v34  ;;  %v916_v1 = vrot.slane %v2767_v49, 4 }
 0x153   : > { %v681_v59 = vrot.slane %v673_v44, 4 }
 0x154   : > { %v615_v45 = vpop.permute.xlu0 %614  ;;  %v942_v2 = vrot.slane %v2770_v50, 4 }
 0x155   : > { %v871_v43 = vpop.permute.xlu1 %870  ;;  %v626_v47 = vpack.i.b16 %v615_v45, %v611_v24  ;;  %v628_v48 = vshrl.u32 %v615_v45, 16 }
 0x156   : > { %v896_v61 = vshrl.u32 %v871_v43, 16  ;;  %v894_v5 = vpack.i.b16 %v871_v43, %v2750_v20 }
 0x157   : > { %v629_v55 = vpack.i.b16 %v628_v48, %v627_v46  ;;  %v651_v56 = vperm.slane %v626_v47, %v2762_v34 }
 0x158   : > { %v2791_v15 = vpack.i.b16 %v896_v61, %v895_v54  ;;  %v2804_v37 = vperm.slane %v894_v5, %v2762_v34 }
 0x159   : > { %v652_v62 = vrot.slane %v651_v56, 4  ;;  %v656_v63 = vsel %vm653_vm1, %v651_v56, %v655_v53  ;;  %v678_v0 = vperm.slane %v629_v55, %v2762_v34 }
 0x15a   : > { %v664_v4 = vperm.slane %v656_v63, %v2772_v51 }
 0x15b   : > { %v654_v6 = vsel %vm653_vm1, %v652_v62, %v646_v42  ;;  %v679_v7 = vrot.slane %v678_v0, 4  ;;  %v682_v8 = vsel %vm653_vm1, %v678_v0, %v681_v59 }
 0x15c   : > { %v660_v10 = vperm.slane %v654_v6, %v2772_v51  ;;  %v667_v11 = vrot.slane %v664_v4, 4  ;;  %v690_v12 = vperm.slane %v682_v8, %v2772_v51  ;;  %v609_v14 = vpop.permute.xlu0 %608 }
 0x15d   : > { %v617_v9 = vpop.permute.xlu1 %616  ;;  %v680_v16 = vsel %vm653_vm1, %v679_v7, %v673_v44  ;;  %v632_v18 = vpack.i.b16 %v609_v14, %v2753_v23  ;;  %v634_v28 = vshrl.u32 %v609_v14, 16 }
 0x15e   : > { %v638_v13 = vpack.i.b16 %v617_v9, %v613_v30  ;;  %v640_v17 = vshrl.u32 %v617_v9, 16  ;;  %v665_v19 = vrot.slane %v660_v10, 4  ;;  %v668_v20 = vsel %vm653_vm1, 0, %v667_v11 }
 0x15f   : > { %v686_v21 = vperm.slane %v680_v16, %v2772_v51  ;;  %v693_v22 = vrot.slane %v690_v12, 4  ;;  %v752_v24 = vrot.slane %v668_v20, 4  ;;  %v747_v32 = vsel %vm653_vm1, %v667_v11, %v660_v10 }
 0x160   : > { %v641_v26 = vpack.i.b16 %v640_v17, %v639_v58  ;;  %v704_v27 = vperm.slane %v638_v13, %v2762_v34  ;;  %v666_v29 = vsel %vm653_vm1, 0, %v665_v19  ;;  %v751_v41 = vperm.slane %v747_v32, %v2762_v34 }
 0x161   : > { %v691_v30 = vrot.slane %v686_v21, 4  ;;  %v694_v31 = vsel %vm653_vm1, 0, %v693_v22  ;;  %v753_v23 = vsel %vm653_vm1, %v752_v24, %v666_v29  ;;  %v766_v33 = vsel %vm653_vm1, %v693_v22, %v686_v21 }
 0x162   : > { %v771_v35 = vrot.slane %v694_v31, 4  ;;  %v705_v36 = vrot.slane %v704_v27, 4  ;;  %v757_v39 = vperm.slane %v753_v23, %v2762_v34  ;;  %v730_v40 = vperm.slane %v641_v26, %v2762_v34 }
 0x163   : > { %v692_v38 = vsel %vm653_vm1, 0, %v691_v30  ;;  %v635_v43 = vpack.i.b16 %v634_v28, %v633_v60  ;;  %v699_v44 = vperm.slane %v632_v18, %v2762_v34  ;;  %v770_v47 = vperm.slane %v766_v33, %v2762_v34 }
 0x164   : > { %v772_v42 = vsel %vm653_vm1, %v771_v35, %v692_v38  ;;  %v758_v46 = vrot.slane %v757_v39, 4  ;;  %v731_v53 = vrot.slane %v730_v40, 4 }
 0x165   : > { %v877_v45 = vpop.permute.xlu1 %876  ;;  %v776_v48 = vperm.slane %v772_v42, %v2762_v34  ;;  %v706_v54 = vsel %vm653_vm1, %v705_v36, %v699_v44  ;;  %v707_v55 = vrot.slane %v699_v44, 4  ;;  %v725_v56 = vperm.slane %v635_v43, %v2762_v34 }
 0x166   : > { %v888_v58 = vpack.i.b16 %v877_v45, %v2760_v25  ;;  %v759_v59 = vsel %vm653_vm1, %v758_v46, %v751_v41  ;;  %v712_v60 = vperm.slane %v706_v54, %v2772_v51  ;;  %v890_v62 = vshrl.u32 %v877_v45, 16  ;;  %v875_v46 = vpop.permute.xlu0 %874 }
 0x167   : > { %v777_v61 = vrot.slane %v776_v48, 4  ;;  %v763_v63 = vperm.slane %v759_v59, %v2772_v51  ;;  %v708_v0 = vsel %vm653_vm1, %v704_v27, %v707_v55  ;;  %v732_v4 = vsel %vm653_vm1, %v731_v53, %v725_v56 }
 0x168   : > { %v733_v5 = vrot.slane %v725_v56, 4  ;;  %v716_v7 = vperm.slane %v708_v0, %v2772_v51  ;;  %v717_v8 = vrot.slane %v712_v60, 4  ;;  %v738_v9 = vperm.slane %v732_v4, %v2772_v51 }
 0x169   : > { %v778_v6 = vsel %vm653_vm1, %v777_v61, %v770_v47  ;;  %v764_v10 = vrot.slane %v763_v63, 4  ;;  %v913_v13 = vperm.slane %v888_v58, %v2762_v34  ;;  %v827_v14 = vshrl.u32 %v763_v63, 16 }
 0x16a   : > { %v782_v11 = vperm.slane %v778_v6, %v2772_v51  ;;  %v734_v12 = vsel %vm653_vm1, %v730_v40, %v733_v5  ;;  %v719_v16 = vrot.slane %v716_v7, 4  ;;  %v743_v18 = vrot.slane %v738_v9, 4 }
 0x16b   : > { %v742_v17 = vperm.slane %v734_v12, %v2772_v51  ;;  %v765_v19 = vsel %vm653_vm1, 0, %v764_v10  ;;  %v718_v26 = vsel %vm653_vm1, 0, %v717_v8  ;;  %v891_v41 = vpack.i.b16 %v890_v62, %v889_v57 }
 0x16c   : > { %v783_v20 = vrot.slane %v782_v11, 4  ;;  %v825_v21 = vpack.i.b16 %v782_v11, %v763_v63  ;;  %v828_v22 = vshrl.u32 %v782_v11, 16  ;;  %v835_v24 = vshrl.u32 %v765_v19, 16 }
 0x16d   : > { %v720_v27 = vsel %vm653_vm1, 0, %v719_v16  ;;  %v745_v28 = vrot.slane %v742_v17, 4  ;;  %v785_v31 = vsel %vm653_vm1, %v719_v16, %v712_v60  ;;  %v744_v35 = vsel %vm653_vm1, 0, %v743_v18 }
 0x16e   : > { %v784_v29 = vsel %vm653_vm1, 0, %v783_v20  ;;  %v829_v30 = vpack.i.b16 %v828_v22, %v827_v14  ;;  %856 = vst.msk [vmem:[#allocation2] sm:$0xf] %vm855_vm2, %v825_v21  ;;  %v790_v32 = vrot.slane %v720_v27, 4  ;;  %v789_v43 = vperm.slane %v785_v31, %v2762_v34 }
 0x16f   : > { %v833_v23 = vpack.i.b16 %v784_v29, %v765_v19  ;;  %v836_v33 = vshrl.u32 %v784_v29, 16  ;;  %v746_v36 = vsel %vm653_vm1, 0, %v745_v28  ;;  %v804_v39 = vsel %vm653_vm1, %v745_v28, %v738_v9 }
 0x170   : > { %858 = vst.msk [vmem:[#allocation2 + $0x8] sm:$0xf] %vm855_vm2, %v829_v30  ;;  %v791_v38 = vsel %vm653_vm1, %v790_v32, %v718_v26  ;;  %v809_v40 = vrot.slane %v746_v36, 4  ;;  %v914_v45 = vrot.slane %v913_v13, 4  ;;  %v808_v47 = vperm.slane %v804_v39, %v2762_v34 }
 0x171   : > { %v837_v42 = vpack.i.b16 %v836_v33, %v835_v24  ;;  %860 = vst.msk [vmem:[#allocation2 + $0x10] sm:$0xf] %vm855_vm2, %v833_v23  ;;  %v795_v44 = vperm.slane %v791_v38, %v2762_v34  ;;  %v917_v53 = vsel %vm653_vm1, %v913_v13, %v916_v1  ;;  %v939_v25 = vperm.slane %v891_v41, %v2762_v34 }
 0x172   : > { %v810_v48 = vsel %vm653_vm1, %v809_v40, %v744_v35  ;;  %v915_v55 = vsel %vm653_vm1, %v914_v45, %v2767_v49  ;;  %v925_v56 = vperm.slane %v917_v53, %v2772_v51  ;;  %v901_v1 = vshrl.u32 %v875_v46, 16 }
 0x173   : > { %862 = vst.msk [vmem:[#allocation2 + $0x18] sm:$0xf] %vm855_vm2, %v837_v42  ;;  %v796_v57 = vrot.slane %v795_v44, 4  ;;  %v814_v54 = vperm.slane %v810_v48, %v2762_v34  ;;  %v921_v58 = vperm.slane %v915_v55, %v2772_v51  ;;  %v940_v59 = vrot.slane %v939_v25, 4 }
 0x174   : > { %v943_v61 = vsel %vm653_vm1, %v939_v25, %v942_v2  ;;  %v928_v63 = vrot.slane %v925_v56, 4  ;;  %v900_v6 = vpack.i.b16 %v2774_v52, %v875_v46  ;;  %v903_v13 = vpack.i.b16 %v902_v3, %v901_v1 }
 0x175   : > { %v797_v60 = vsel %vm653_vm1, %v796_v57, %v789_v43  ;;  %v815_v62 = vrot.slane %v814_v54, 4  ;;  %v951_v0 = vperm.slane %v943_v61, %v2772_v51  ;;  %v926_v5 = vrot.slane %v921_v58, 4 }
 0x176   : > { %v801_v4 = vperm.slane %v797_v60, %v2772_v51  ;;  %v941_v49 = vsel %vm653_vm1, %v940_v59, %v2770_v50  ;;  %v929_v8 = vsel %vm653_vm1, 0, %v928_v63  ;;  %v968_v22 = vrot.slane %v2804_v37, 4 }
 0x177   : > { %v816_v7 = vsel %vm653_vm1, %v815_v62, %v808_v47  ;;  %v947_v2 = vperm.slane %v941_v49, %v2772_v51  ;;  %v954_v9 = vrot.slane %v951_v0, 4  ;;  %v927_v12 = vsel %vm653_vm1, 0, %v926_v5 }
 0x178   : > { %v802_v10 = vrot.slane %v801_v4, 4  ;;  %v820_v11 = vperm.slane %v816_v7, %v2772_v51  ;;  %v843_v14 = vshrl.u32 %v801_v4, 16  ;;  %v1013_v17 = vrot.slane %v929_v8, 4 }
 0x179   : > { %v952_v16 = vrot.slane %v947_v2, 4  ;;  %v955_v50 = vsel %vm653_vm1, 0, %v954_v9  ;;  %v986_v24 = vperm.slane %v2791_v15, %v2762_v34  ;;  %v1008_v26 = vsel %vm653_vm1, %v928_v63, %v921_v58 }
 0x17a   : > { %v803_v18 = vsel %vm653_vm1, 0, %v802_v10  ;;  %v821_v19 = vrot.slane %v820_v11, 4  ;;  %v841_v20 = vpack.i.b16 %v820_v11, %v801_v4  ;;  %v844_v21 = vshrl.u32 %v820_v11, 16 }
 0x17b   : > { %v1014_v52 = vsel %vm653_vm1, %v1013_v17, %v927_v12  ;;  %v953_v28 = vsel %vm653_vm1, 0, %v952_v16  ;;  %v851_v31 = vshrl.u32 %v803_v18, 16  ;;  %v1032_v23 = vrot.slane %v955_v50, 4 }
 0x17c   : > { %v822_v3 = vsel %vm653_vm1, 0, %v821_v19  ;;  %v845_v27 = vpack.i.b16 %v844_v21, %v843_v14  ;;  %857 = vst.msk [vmem:[#allocation2 + $0x4] sm:$0xf] %vm855_vm2, %v841_v20  ;;  %v1018_v29 = vperm.slane %v1014_v52, %v2762_v34  ;;  %v1012_v15 = vperm.slane %v1008_v26, %v2762_v34 }
 0x17d   : > { %v849_v30 = vpack.i.b16 %v822_v3, %v803_v18  ;;  %v852_v32 = vshrl.u32 %v822_v3, 16  ;;  %v965_v35 = vperm.slane %v900_v6, %v2762_v34  ;;  %v991_v36 = vperm.slane %v903_v13, %v2762_v34 }
 0x17e   : > { %859 = vst.msk [vmem:[#allocation2 + $0xc] sm:$0xf] %vm855_vm2, %v845_v27  ;;  %v1019_v33 = vrot.slane %v1018_v29, 4  ;;  %v994_v38 = vrot.slane %v986_v24, 4  ;;  %v1027_v40 = vsel %vm653_vm1, %v954_v9, %v947_v2  ;;  %v1033_v41 = vsel %vm653_vm1, %v1032_v23, %v953_v28 }
 0x17f   : > { %v853_v39 = vpack.i.b16 %v852_v32, %v851_v31  ;;  %861 = vst.msk [vmem:[#allocation2 + $0x14] sm:$0xf] %vm855_vm2, %v849_v30  ;;  %v1037_v43 = vperm.slane %v1033_v41, %v2762_v34  ;;  %v966_v44 = vrot.slane %v965_v35, 4  ;;  %v969_v45 = vsel %vm653_vm1, %v965_v35, %v968_v22 }
 0x180   : > { %v1020_v42 = vsel %vm653_vm1, %v1019_v33, %v1012_v15  ;;  %v977_v47 = vperm.slane %v969_v45, %v2772_v51  ;;  %v992_v48 = vrot.slane %v991_v36, 4  ;;  %v995_v53 = vsel %vm653_vm1, %v991_v36, %v994_v38 }
 0x181   : > { %863 = vst.msk [vmem:[#allocation2 + $0x1c] sm:$0xf] %vm855_vm2, %v853_v39  ;;  %v1024_v46 = vperm.slane %v1020_v42, %v2772_v51  ;;  %v1031_v25 = vperm.slane %v1027_v40, %v2762_v34  ;;  %v1038_v57 = vrot.slane %v1037_v43, 4  ;;  %v967_v54 = vsel %vm653_vm1, %v966_v44, %v2804_v37 }
 0x182   : > { %v1003_v55 = vperm.slane %v995_v53, %v2772_v51  ;;  %v973_v58 = vperm.slane %v967_v54, %v2772_v51  ;;  %v980_v59 = vrot.slane %v977_v47, 4  ;;  %v993_v1 = vsel %vm653_vm1, %v992_v48, %v986_v24 }
 0x183   : > { %v1025_v56 = vrot.slane %v1024_v46, 4  ;;  %v1039_v61 = vsel %vm653_vm1, %v1038_v57, %v1031_v25  ;;  %v1088_v5 = vshrl.u32 %v1024_v46, 16  ;;  %v999_v37 = vperm.slane %v993_v1, %v2772_v51 }
 0x184   : > { %v1006_v60 = vrot.slane %v1003_v55, 4  ;;  %v1043_v63 = vperm.slane %v1039_v61, %v2772_v51  ;;  %v978_v0 = vrot.slane %v973_v58, 4  ;;  %v981_v4 = vsel %vm653_vm1, 0, %v980_v59 }
 0x185   : > { %v1026_v62 = vsel %vm653_vm1, 0, %v1025_v56  ;;  %v1004_v10 = vrot.slane %v999_v37, 4  ;;  %v1051_v11 = vrot.slane %v981_v4, 4  ;;  %v1046_v14 = vsel %vm653_vm1, %v980_v59, %v973_v58 }
 0x186   : > { %v1007_v49 = vsel %vm653_vm1, 0, %v1006_v60  ;;  %v1044_v6 = vrot.slane %v1043_v63, 4  ;;  %v1086_v7 = vpack.i.b16 %v1043_v63, %v1024_v46  ;;  %v1089_v8 = vshrl.u32 %v1043_v63, 16 }
 0x187   : > { %v979_v2 = vsel %vm653_vm1, 0, %v978_v0  ;;  %v1096_v9 = vshrl.u32 %v1026_v62, 16  ;;  %v1070_v16 = vrot.slane %v1007_v49, 4  ;;  %v1005_v18 = vsel %vm653_vm1, 0, %v1004_v10 }
 0x188   : > { %v1045_v12 = vsel %vm653_vm1, 0, %v1044_v6  ;;  %v1090_v13 = vpack.i.b16 %v1089_v8, %v1088_v5  ;;  %1116 = vst.msk [vmem:[#allocation3] sm:$0xf] %vm855_vm2, %v1086_v7  ;;  %v1052_v19 = vsel %vm653_vm1, %v1051_v11, %v979_v2  ;;  %v1065_v21 = vsel %vm653_vm1, %v1006_v60, %v999_v37 }
 0x189   : > { %v1094_v50 = vpack.i.b16 %v1045_v12, %v1026_v62  ;;  %v1097_v17 = vshrl.u32 %v1045_v12, 16  ;;  %v1056_v20 = vperm.slane %v1052_v19, %v2762_v34  ;;  %v1071_v22 = vsel %vm653_vm1, %v1070_v16, %v1005_v18 }
 0x18a   : > { %1118 = vst.msk [vmem:[#allocation3 + $0x8] sm:$0xf] %vm855_vm2, %v1090_v13  ;;  %v1075_v26 = vperm.slane %v1071_v22, %v2762_v34  ;;  %v1050_v52 = vperm.slane %v1046_v14, %v2762_v34  ;;  %v1069_v27 = vperm.slane %v1065_v21, %v2762_v34 }
 0x18b   : > { %v1098_v24 = vpack.i.b16 %v1097_v17, %v1096_v9  ;;  %1120 = vst.msk [vmem:[#allocation3 + $0x10] sm:$0xf] %vm855_vm2, %v1094_v50  ;;  %v1057_v3 = vrot.slane %v1056_v20, 4 }
 0x18c   : > { %v1076_v28 = vrot.slane %v1075_v26, 4 }
 0x18d   : > { %1122 = vst.msk [vmem:[#allocation3 + $0x18] sm:$0xf] %vm855_vm2, %v1098_v24  ;;  %v1058_v29 = vsel %vm653_vm1, %v1057_v3, %v1050_v52 }
 0x18e   : > { %v1062_v30 = vperm.slane %v1058_v29, %v2772_v51  ;;  %v1077_v31 = vsel %vm653_vm1, %v1076_v28, %v1069_v27 }
 0x18f   : > { %v1081_v32 = vperm.slane %v1077_v31, %v2772_v51 }
 0x190   : > { %v1063_v23 = vrot.slane %v1062_v30, 4  ;;  %v1104_v35 = vshrl.u32 %v1062_v30, 16 }
 0x191   : > { %v1082_v15 = vrot.slane %v1081_v32, 4  ;;  %v1102_v33 = vpack.i.b16 %v1081_v32, %v1062_v30  ;;  %v1105_v36 = vshrl.u32 %v1081_v32, 16 }
 0x192   : > { %v1064_v38 = vsel %vm653_vm1, 0, %v1063_v23 }
 0x193   : > { %v1083_v39 = vsel %vm653_vm1, 0, %v1082_v15  ;;  %v1106_v40 = vpack.i.b16 %v1105_v36, %v1104_v35  ;;  %1117 = vst.msk [vmem:[#allocation3 + $0x4] sm:$0xf] %vm855_vm2, %v1102_v33  ;;  %v1112_v41 = vshrl.u32 %v1064_v38, 16 }
 0x194   : > { %v1110_v34 = vpack.i.b16 %v1083_v39, %v1064_v38  ;;  %v1113_v42 = vshrl.u32 %v1083_v39, 16 }
 0x195   : > { %1119 = vst.msk [vmem:[#allocation3 + $0xc] sm:$0xf] %vm855_vm2, %v1106_v40 }
 0x196   : > { %v1114_v43 = vpack.i.b16 %v1113_v42, %v1112_v41  ;;  %1121 = vst.msk [vmem:[#allocation3 + $0x14] sm:$0xf] %vm855_vm2, %v1110_v34 }
 0x198   : > { %1123 = vst.msk [vmem:[#allocation3 + $0x1c] sm:$0xf] %vm855_vm2, %v1114_v43 }
 0x199 PF: > { %p2103_p12 = scmp.ne.s32.totalorder %s2484_s18, 0 }
 0x19a   : > { %s3193_s11 = sld [smem:[#allocation22_spill]] (!%p2103_p12)  ;;  %s2516_s29 = smov (!%p2103_p12), 104  }
 0x19b   : > { %1126 = sbr.rel (%p2103_p12) target bundleno = 1802 (0x70a), region = 109  ;;  %s3194_s0 = sld [smem:[#allocation24_spill]] (!%p2103_p12) }
 0x19c   : > { %s2518_s6 = smov (!%p2103_p12), 112   ;;  %s2521_s2 = smov (!%p2103_p12), 8  }
 0x19d   : > { %s2522_s16 = smov (!%p2103_p12), 16   ;;  %s2523_s15 = smov (!%p2103_p12), 24  }
 0x19e   : > { %s3195_s7 = sld [smem:[#allocation23_spill]] (!%p2103_p12) }
 0x1a0   : > { %v2216_v51 = vld [vmem:[%s3193_s11 + $0x8] sm:$0xff]  ;;  %vm1147_vm3 = vcmask 261120   ;;  %v2515_v44 = vmov 0.0   ;;  %v2215_v45 = vld [vmem:[%s3193_s11] sm:$0xff]  ;;  %vm1300_vm4 = vcmask 64512   ;;  %v2219_v59 = vld [vmem:[#allocation2 + $0x10] sm:$0xff] }
 0x1a1   : > { %1746 = vst.msk [vmem:[#allocation5] sm:$0xff] %vm1147_vm3, %v2515_v44  ;;  %1157 = vmatpush.bf16.msra.mxu0 %v2216_v51  ;;  %v2944_v46 = vld [vmem:[%s2717_s17] sm:$0xff]  ;;  %s2517_s17 = smov 120   ;;  %v2218_v58 = vld [vmem:[#allocation2 + $0x8] sm:$0xff]  ;;  %v2220_v61 = vld [vmem:[#allocation2 + $0x18] sm:$0xff]  ;;  %v1353_v62 = vsel %vm1300_vm4, %v2219_v59, 0 }
 0x1a2   : > { %v1129_v47 = vpack.c.bf16 %v2944_v46, %v2944_v46  ;;  %v2952_v48 = vld [vmem:[%s3194_s0] sm:$0xff]  ;;  %v1329_v60 = vsel %vm1300_vm4, %v2218_v58, 0  ;;  %v1377_v63 = vsel %vm1300_vm4, %v2220_v61, 0  ;;  %1362 = vmatpush.bf16.xpose.msra.mxu3 %v1353_v62  ;;  %v2519_v0 = vmov 1983009808  }
 0x1a3   : > { %v1134_v53 = vperm.slane %v2952_v48, 0  ;;  %v2217_v56 = vld [vmem:[#allocation2] sm:$0xff]  ;;  %1338 = vmatpush.bf16.xpose.msra.mxu2 %v1329_v60  ;;  %v1186_v4 = vunpack.c.l.s4 %v2519_v0  ;;  %v2520_v9 = vmov 1934713408   ;;  %vm1195_vm5 = vcmask 1047556  }
 0x1a4   : > { %v1305_v1 = vsel %vm1300_vm4, %v2217_v56, 0  ;;  %v1200_v10 = vunpack.c.l.s4 %v2520_v9  ;;  %vm1396_vm6 = vcmask 130048   ;;  %vm1676_vm7 = vcmask 195584  }
 0x1a5   : > { %1158 = vmatpush.bf16.msra.mxu0 %v2215_v45  ;;  %1314 = vmatpush.bf16.xpose.msra.mxu1 %v1305_v1  ;;  %v2959_v49 = vunpack.c.0.s8 %v1186_v4 }
 0x1a6   : > { %v2963_v17 = vunpack.c.0.s8 %v1200_v10 }
 0x1a8   : > { %2112 = vmatmul.msk.bf16.vlgmr.msra.gmra.mxu0 %vm1147_vm3, %v1129_v47 }
 0x1a9   : > { %1386 = vmatpush.bf16.xpose.msrb.mxu0 %v1377_v63 }
 0x225   : > { %v1160_v25 = vpop.f32.mrf.mxu0 }
 0x226   : > { %v1161_v57 = vadd.f32 %v1160_v25, %v1134_v53 }
 0x228   : > { %v1164_v54 = vpack.c.bf16 %v1161_v57, %v1161_v57 }
 0x22a   : > { %1170 = vrot.lane.b32.xlu1 %v1164_v54, %s2516_s29  ;;  %1166 = vrot.lane.b32.xlu0 %v1164_v54, %s2517_s17  ;;  %v1175_v7 = vshrl.u32 %v1164_v54, 16 }
 0x22d   : > { %v1162_v55 = vpop.f32.mrf.mxu0 }
 0x232   : > { %1168 = vrot.lane.b32.xlu0 %v1164_v54, %s2518_s6 }
 0x29c   : > { %v1167_v5 = vpop.permute.xlu0 %1166  ;;  %v1171_v2 = vpop.permute.xlu1 %1170 }
 0x29d   : > { %v1176_v37 = vshrl.u32 %v1167_v5, 16  ;;  %v1174_v6 = vpack.i.b16 %v1167_v5, %v1164_v54  ;;  %v1182_v13 = vshrl.u32 %v1171_v2, 16 }
 0x29f   : > { %v1177_v8 = vpack.i.b16 %v1176_v37, %v1175_v7  ;;  %v1188_v11 = vperm.slane %v1174_v6, %v2959_v49 }
 0x2a1   : > { %v1215_v14 = vperm.slane %v1177_v8, %v2959_v49  ;;  %v1197_v18 = vrot.slane %v1188_v11, 4 }
 0x2a3   : > { %v1223_v21 = vrot.slane %v1215_v14, 4 }
 0x2a4   : > { %v1169_v12 = vpop.permute.xlu0 %1168 }
 0x2a5   : > { %v1180_v16 = vpack.i.b16 %v1171_v2, %v1169_v12  ;;  %v1181_v50 = vshrl.u32 %v1169_v12, 16 }
 0x2a7   : > { %v1183_v19 = vpack.i.b16 %v1182_v13, %v1181_v50  ;;  %v1193_v20 = vperm.slane %v1180_v16, %v2959_v49 }
 0x2a9   : > { %v1194_v22 = vrot.slane %v1193_v20, 4  ;;  %v1198_v24 = vsel %vm1195_vm5, %v1193_v20, %v1197_v18  ;;  %v1220_v26 = vperm.slane %v1183_v19, %v2959_v49 }
 0x2aa   : > { %v1206_v52 = vperm.slane %v1198_v24, %v2963_v17 }
 0x2ab   : > { %v1196_v3 = vsel %vm1195_vm5, %v1194_v22, %v1188_v11  ;;  %v1221_v27 = vrot.slane %v1220_v26, 4  ;;  %v1224_v28 = vsel %vm1195_vm5, %v1220_v26, %v1223_v21 }
 0x2ac   : > { %v1202_v29 = vperm.slane %v1196_v3, %v2963_v17  ;;  %v1209_v30 = vrot.slane %v1206_v52, 4  ;;  %v1232_v31 = vperm.slane %v1224_v28, %v2963_v17 }
 0x2ad   : > { %v1222_v32 = vsel %vm1195_vm5, %v1221_v27, %v1215_v14 }
 0x2ae   : > { %v1207_v23 = vrot.slane %v1202_v29, 4  ;;  %v1210_v15 = vsel %vm1195_vm5, 0, %v1209_v30  ;;  %v1228_v33 = vperm.slane %v1222_v32, %v2963_v17  ;;  %v1235_v35 = vrot.slane %v1232_v31, 4 }
 0x2af   : > { %v1242_v36 = vrot.slane %v1210_v15, 4  ;;  %v1237_v34 = vsel %vm1195_vm5, %v1209_v30, %v1202_v29 }
 0x2b0   : > { %v1208_v38 = vsel %vm1195_vm5, 0, %v1207_v23  ;;  %v1233_v39 = vrot.slane %v1228_v33, 4  ;;  %v1236_v40 = vsel %vm1195_vm5, 0, %v1235_v35  ;;  %v1256_v44 = vsel %vm1195_vm5, %v1235_v35, %v1228_v33 }
 0x2b1   : > { %v1261_v41 = vrot.slane %v1236_v40, 4  ;;  %v1243_v42 = vsel %vm1195_vm5, %v1242_v36, %v1208_v38  ;;  %v1241_v47 = vperm.slane %v1237_v34, %v2959_v49  ;;  %v1260_v54 = vperm.slane %v1256_v44, %v2959_v49  ;;  %v2222_v44 = vld [vmem:[#allocation3 + $0x8] sm:$0xff] }
 0x2b2   : > { %v1234_v43 = vsel %vm1195_vm5, 0, %v1233_v39  ;;  %v1247_v51 = vperm.slane %v1243_v42, %v2959_v49  ;;  %1491 = vmatpush.bf16.msrb.mxu2 %v2222_v44 }
 0x2b3   : > { %v1262_v45 = vsel %vm1195_vm5, %v1261_v41, %v1234_v43 }
 0x2b4   : > { %v1248_v53 = vrot.slane %v1247_v51, 4  ;;  %v1266_v25 = vperm.slane %v1262_v45, %v2959_v49  ;;  %v2221_v51 = vld [vmem:[#allocation3] sm:$0xff]  ;;  %v2223_v45 = vld [vmem:[#allocation3 + $0x10] sm:$0xff] }
 0x2b5   : > { %1469 = vmatpush.bf16.msrb.mxu1 %v2221_v51  ;;  %1513 = vmatpush.bf16.msrb.mxu3 %v2223_v45 }
 0x2b6   : > { %v1249_v57 = vsel %vm1195_vm5, %v1248_v53, %v1241_v47  ;;  %v1267_v55 = vrot.slane %v1266_v25, 4  ;;  %v2224_v47 = vld [vmem:[#allocation3 + $0x18] sm:$0xff] }
 0x2b7   : > { %v1253_v56 = vperm.slane %v1249_v57, %v2963_v17  ;;  %1535 = vmatpush.bf16.msra.mxu0 %v2224_v47 }
 0x2b8   : > { %v1268_v58 = vsel %vm1195_vm5, %v1267_v55, %v1260_v54 }
 0x2b9   : > { %v1272_v59 = vperm.slane %v1268_v58, %v2963_v17  ;;  %v1254_v61 = vrot.slane %v1253_v56, 4  ;;  %v1278_v1 = vshrl.u32 %v1253_v56, 16 }
 0x2bb   : > { %v1277_v60 = vpack.i.b16 %v1272_v59, %v1253_v56  ;;  %v1279_v62 = vshrl.u32 %v1272_v59, 16  ;;  %v1255_v63 = vsel %vm1195_vm5, 0, %v1254_v61  ;;  %v1273_v0 = vrot.slane %v1272_v59, 4 }
 0x2bc   : > { %v1284_v6 = vshrl.u32 %v1255_v63, 16 }
 0x2bd   : > { %2117 = vmatmul.msk.bf16.vlgmr.msra.gmra.mxu1 %vm1300_vm4, %v1277_v60  ;;  %v1280_v4 = vpack.i.b16 %v1279_v62, %v1278_v1  ;;  %v1274_v5 = vsel %vm1195_vm5, 0, %v1273_v0 }
 0x2be   : > { %v1283_v37 = vpack.i.b16 %v1274_v5, %v1255_v63  ;;  %v1285_v7 = vshrl.u32 %v1274_v5, 16 }
 0x2bf   : > { %2122 = vmatmul.msk.bf16.vlgmr.msra.gmra.mxu2 %vm1300_vm4, %v1280_v4 }
 0x2c0   : > { %2127 = vmatmul.msk.bf16.vlgmr.msra.gmra.mxu3 %vm1300_vm4, %v1283_v37  ;;  %v1286_v8 = vpack.i.b16 %v1285_v7, %v1284_v6 }
 0x2c2   : > { %2132 = vmatmul.msk.bf16.vlgmr.msrb.gmra.mxu0 %vm1300_vm4, %v1286_v8 }
 0x33a   : > { %v1316_v2 = vpop.f32.mrf.mxu1 }
 0x33b   : > { %v1392_v21 = vmul.f32 0.35355338, %v1316_v2 }
 0x33d   : > { %v1397_v26 = vsel %vm1396_vm6, %v1392_v21, -inf }
 0x33f   : > { %v1388_v9 = vpop.f32.mrf.mxu0 }
 0x340   : > { %v1395_v10 = vmul.f32 0.35355338, %v1388_v9 }
 0x342   : > { %v1318_v11 = vpop.f32.mrf.mxu1  ;;  %v1340_v12 = vpop.f32.mrf.mxu2  ;;  %v1406_v13 = vsel %vm1396_vm6, %v1395_v10, -inf }
 0x343   : > { %v1393_v14 = vmul.f32 0.35355338, %v1340_v12  ;;  %1407 = vmax.xlane.f32.xlu0 %v1406_v13  ;;  %v1364_v16 = vpop.f32.mrf.mxu3 }
 0x344   : > { %v1394_v50 = vmul.f32 0.35355338, %v1364_v16 }
 0x345   : > { %v1400_v18 = vsel %vm1396_vm6, %v1393_v14, -inf }
 0x346   : > { %1401 = vmax.xlane.f32.xlu1 %v1400_v18  ;;  %v1403_v19 = vsel %vm1396_vm6, %v1394_v50, -inf }
 0x347   : > { %v1390_v20 = vpop.f32.mrf.mxu0  ;;  %1404 = vmax.xlane.f32.xlu2 %v1403_v19 }
 0x34a   : > { %v1342_v22 = vpop.f32.mrf.mxu2 }
 0x34b   : > { %v1366_v24 = vpop.f32.mrf.mxu3 }
 0x34f   : > { %1398 = vmax.xlane.f32.xlu2 %v1397_v26 }
 0x3b6   : > { %v1408_v35 = vpop.xlane.xlu0 %1407 }
 0x3b7   : > { %v1412_v38 = vsub.f32 %v1395_v10, %v1408_v35 }
 0x3b9   : > { %v1402_v3 = vpop.xlane.xlu1 %1401  ;;  %v1419_v40 = vmul.f32 1.442695, %v1412_v38 }
 0x3ba   : > { %v1405_v52 = vpop.xlane.xlu2 %1404  ;;  %v1410_v29 = vsub.f32 %v1393_v14, %v1402_v3 }
 0x3bb   : > { %v1411_v23 = vsub.f32 %v1394_v50, %v1405_v52 }
 0x3bc   : > { %v1415_v31 = vmul.f32 1.442695, %v1410_v29 }
 0x3bd   : > { %v1417_v33 = vmul.f32 1.442695, %v1411_v23 }
 0x3c2   : > { %v1399_v27 = vpop.xlane.xlu2 %1398 }
 0x3c3   : > { %v1409_v28 = vsub.f32 %v1392_v21, %v1399_v27 }
 0x3c5   : > { %v1413_v30 = vmul.f32 1.442695, %v1409_v28 }
 0x3c7   : > { %2356 = vpow2.f32 %v1413_v30 }
 0x3c8   : > { %2358 = vpow2.f32 %v1415_v31 }
 0x3c9   : > { %2360 = vpow2.f32 %v1417_v33 }
 0x3ca   : > { %2362 = vpow2.f32 %v1419_v40 }
 0x3cd   : > { %v2357_v32 = vpop.eup %2356 }
 0x3ce   : > { %v1421_v15 = vsel %vm1396_vm6, %v2357_v32, 0.0  ;;  %v2359_v36 = vpop.eup %2358 }
 0x3cf   : > { %1422 = vadd.xlane.f32.xlu2 %v1421_v15  ;;  %v1424_v39 = vsel %vm1396_vm6, %v2359_v36, 0.0  ;;  %v2361_v34 = vpop.eup %2360 }
 0x3d0   : > { %v1427_v41 = vsel %vm1396_vm6, %v2361_v34, 0.0  ;;  %v2363_v42 = vpop.eup %2362 }
 0x3d1   : > { %v1430_v43 = vsel %vm1396_vm6, %v2363_v42, 0.0 }
 0x3d7   : > { %1425 = vadd.xlane.f32.xlu2 %v1424_v39 }
 0x3df   : > { %1428 = vadd.xlane.f32.xlu2 %v1427_v41 }
 0x3e7   : > { %1431 = vadd.xlane.f32.xlu2 %v1430_v43 }
 0x442   : > { %v1423_v53 = vpop.xlane.xlu2 %1422 }
 0x443   : > { %2364 = vrcp.f32 %v1423_v53 }
 0x449   : > { %v2365_v25 = vpop.eup %2364 }
 0x44a   : > { %v1437_v57 = vmul.f32 %v2365_v25, %v2357_v32  ;;  %v1426_v54 = vpop.xlane.xlu2 %1425 }
 0x44b   : > { %2366 = vrcp.f32 %v1426_v54 }
 0x44c   : > { %v1441_v55 = vpack.c.bf16 %v1437_v57, %v1437_v57 }
 0x44e   : > { %2137 = vmatmul.msk.bf16.vlgmr.msrb.gmra.mxu1 %vm1396_vm6, %v1441_v55 }
 0x451   : > { %v2367_v56 = vpop.eup %2366 }
 0x452   : > { %v1438_v58 = vmul.f32 %v2367_v56, %v2359_v36  ;;  %v1429_v59 = vpop.xlane.xlu2 %1428 }
 0x453   : > { %2368 = vrcp.f32 %v1429_v59 }
 0x454   : > { %v1442_v61 = vpack.c.bf16 %v1438_v58, %v1438_v58 }
 0x456   : > { %2142 = vmatmul.msk.bf16.vlgmr.msrb.gmra.mxu2 %vm1396_vm6, %v1442_v61 }
 0x459   : > { %v2369_v1 = vpop.eup %2368 }
 0x45a   : > { %v1439_v60 = vmul.f32 %v2369_v1, %v2361_v34  ;;  %v1432_v62 = vpop.xlane.xlu2 %1431 }
 0x45b   : > { %2370 = vrcp.f32 %v1432_v62 }
 0x45c   : > { %v1443_v63 = vpack.c.bf16 %v1439_v60, %v1439_v60 }
 0x45e   : > { %2147 = vmatmul.msk.bf16.vlgmr.msrb.gmra.mxu3 %vm1396_vm6, %v1443_v63 }
 0x461   : > { %v2371_v0 = vpop.eup %2370 }
 0x462   : > { %v1440_v4 = vmul.f32 %v2371_v0, %v2363_v42 }
 0x464   : > { %v1444_v5 = vpack.c.bf16 %v1440_v4, %v1440_v4 }
 0x466   : > { %2152 = vmatmul.msk.bf16.vlgmr.msra.gmra.mxu0 %vm1396_vm6, %v1444_v5 }
 0x4cb   : > { %v1471_v37 = vpop.f32.mrf.mxu1 }
 0x4cc   : > { %v1541_v2 = vpack.c.bf16 %v1471_v37, %v1471_v37 }
 0x4ce   : > { %v1548_v10 = vshrl.u32 %v1541_v2, 16 }
 0x4d3   : > { %v1473_v6 = vpop.f32.mrf.mxu1 }
 0x4d9   : > { %v1493_v7 = vpop.f32.mrf.mxu2 }
 0x4da   : > { %v1542_v8 = vpack.c.bf16 %v1493_v7, %v1493_v7 }
 0x4dc   : > { %v1549_v9 = vshrl.u32 %v1542_v8, 16  ;;  %v1547_v11 = vpack.i.b16 %v1542_v8, %v1541_v2 }
 0x4de   : > { %v1550_v14 = vpack.i.b16 %v1549_v9, %v1548_v10  ;;  %v1561_v18 = vperm.slane %v1547_v11, %v2959_v49 }
 0x4e0   : > { %v1587_v20 = vperm.slane %v1550_v14, %v2959_v49  ;;  %v1569_v26 = vrot.slane %v1561_v18, 4 }
 0x4e1   : > { %v1495_v12 = vpop.f32.mrf.mxu2  ;;  %v1515_v13 = vpop.f32.mrf.mxu3 }
 0x4e2   : > { %v1543_v16 = vpack.c.bf16 %v1515_v13, %v1515_v13  ;;  %v1595_v28 = vrot.slane %v1587_v20, 4 }
 0x4e3   : > { %v1537_v50 = vpop.f32.mrf.mxu0 }
 0x4e4   : > { %v1544_v19 = vpack.c.bf16 %v1537_v50, %v1537_v50  ;;  %v1554_v21 = vshrl.u32 %v1543_v16, 16 }
 0x4e6   : > { %v1553_v22 = vpack.i.b16 %v1544_v19, %v1543_v16  ;;  %v1555_v24 = vshrl.u32 %v1544_v19, 16 }
 0x4e8   : > { %v1556_v52 = vpack.i.b16 %v1555_v24, %v1554_v21  ;;  %v1566_v3 = vperm.slane %v1553_v22, %v2959_v49  ;;  %v2226_v21 = vld [vmem:[%s3195_s7 + $0x8] sm:$0xff]  ;;  %v2225_v22 = vld [vmem:[%s3195_s7] sm:$0xff] }
 0x4e9   : > { %v1517_v27 = vpop.f32.mrf.mxu3  ;;  %1704 = vmatpush.bf16.msra.mxu1 %v2226_v21 }
 0x4ea   : > { %v1567_v29 = vrot.slane %v1566_v3, 4  ;;  %v1570_v30 = vsel %vm1195_vm5, %v1566_v3, %v1569_v26  ;;  %v1592_v31 = vperm.slane %v1556_v52, %v2959_v49 }
 0x4eb   : > { %v1578_v32 = vperm.slane %v1570_v30, %v2963_v17  ;;  %v1539_v23 = vpop.f32.mrf.mxu0 }
 0x4ec   : > { %v1568_v15 = vsel %vm1195_vm5, %v1567_v29, %v1561_v18  ;;  %v1593_v33 = vrot.slane %v1592_v31, 4  ;;  %v1596_v35 = vsel %vm1195_vm5, %v1592_v31, %v1595_v28  ;;  %v1683_v29 = vperm.slane %v2952_v48, 3 }
 0x4ed   : > { %v1574_v36 = vperm.slane %v1568_v15, %v2963_v17  ;;  %v1581_v38 = vrot.slane %v1578_v32, 4  ;;  %v1604_v39 = vperm.slane %v1596_v35, %v2963_v17  ;;  %1705 = vmatpush.bf16.msra.mxu1 %v2225_v22 }
 0x4ee   : > { %v1594_v40 = vsel %vm1195_vm5, %v1593_v33, %v1587_v20  ;;  %v2524_v33 = vmov 32.0  }
 0x4ef   : > { %v1579_v34 = vrot.slane %v1574_v36, 4  ;;  %v1582_v41 = vsel %vm1195_vm5, 0, %v1581_v38  ;;  %v1600_v42 = vperm.slane %v1594_v40, %v2963_v17  ;;  %v1607_v43 = vrot.slane %v1604_v39, 4 }
 0x4f0   : > { %v1614_v51 = vrot.slane %v1582_v41, 4  ;;  %v1609_v53 = vsel %vm1195_vm5, %v1581_v38, %v1574_v36  ;;  %2372 = vrcp.f32 %v2524_v33 }
 0x4f1   : > { %v1580_v44 = vsel %vm1195_vm5, 0, %v1579_v34  ;;  %v1605_v45 = vrot.slane %v1600_v42, 4  ;;  %v1608_v47 = vsel %vm1195_vm5, 0, %v1607_v43  ;;  %v1628_v56 = vsel %vm1195_vm5, %v1607_v43, %v1600_v42 }
 0x4f2   : > { %v1615_v25 = vsel %vm1195_vm5, %v1614_v51, %v1580_v44  ;;  %v1633_v57 = vrot.slane %v1608_v47, 4  ;;  %v1613_v59 = vperm.slane %v1609_v53, %v2959_v49  ;;  %v1632_v62 = vperm.slane %v1628_v56, %v2959_v49 }
 0x4f3   : > { %v1606_v54 = vsel %vm1195_vm5, 0, %v1605_v45  ;;  %v1619_v55 = vperm.slane %v1615_v25, %v2959_v49 }
 0x4f4   : > { %v1634_v58 = vsel %vm1195_vm5, %v1633_v57, %v1606_v54 }
 0x4f5   : > { %v1620_v61 = vrot.slane %v1619_v55, 4  ;;  %v1638_v1 = vperm.slane %v1634_v58, %v2959_v49  ;;  %v1741_v58 = vperm.slane %v2952_v48, 5 }
 0x4f6   : > { %v2373_v35 = vpop.eup %2372 }
 0x4f7   : > { %v1621_v60 = vsel %vm1195_vm5, %v1620_v61, %v1613_v59  ;;  %v1639_v63 = vrot.slane %v1638_v1, 4  ;;  %v1716_v36 = vmul.f32 32.0, %v2373_v35  ;;  %vm1720_vm8 = vweird.f32 %v2373_v35 }
 0x4f8   : > { %v1625_v0 = vperm.slane %v1621_v60, %v2963_v17  ;;  %v1743_v61 = vperm.slane %v2952_v48, 6 }
 0x4f9   : > { %v1640_v4 = vsel %vm1195_vm5, %v1639_v63, %v1632_v62  ;;  %v1717_v38 = vsub.f32 1.0, %v1716_v36 }
 0x4fa   : > { %v1644_v5 = vperm.slane %v1640_v4, %v2963_v17  ;;  %v1626_v37 = vrot.slane %v1625_v0, 4  ;;  %v1650_v6 = vshrl.u32 %v1625_v0, 16 }
 0x4fb   : > { %v1718_v39 = vmul.f32 %v2373_v35, %v1717_v38 }
 0x4fc   : > { %v1651_v7 = vshrl.u32 %v1644_v5, 16  ;;  %v1627_v8 = vsel %vm1195_vm5, 0, %v1626_v37  ;;  %v1645_v2 = vrot.slane %v1644_v5, 4  ;;  %v1649_v9 = vpack.i.b16 %v1644_v5, %v1625_v0 }
 0x4fd   : > { %v1656_v13 = vshrl.u32 %v1627_v8, 16  ;;  %v1719_v40 = vadd.f32 %v2373_v35, %v1718_v39 }
 0x4fe   : > { %v1652_v10 = vpack.i.b16 %v1651_v7, %v1650_v6  ;;  %v1646_v11 = vsel %vm1195_vm5, 0, %v1645_v2 }
 0x4ff   : > { %v1655_v12 = vpack.i.b16 %v1646_v11, %v1627_v8  ;;  %v1657_v49 = vshrl.u32 %v1646_v11, 16  ;;  %v1721_v34 = vsel %vm1720_vm8, %v2373_v35, %v1719_v40 }
 0x500   : > { %v1659_v14 = vunpack.c.l.b16 %v1652_v10 }
 0x501   : > { %v1663_v16 = vunpack.c.l.b16 %v1655_v12  ;;  %v1658_v50 = vpack.i.b16 %v1657_v49, %v1656_v13 }
 0x502   : > { %v1660_v18 = vpack.c.b16 %v1659_v14, %v1659_v14 }
 0x503   : > { %v1664_v19 = vpack.c.b16 %v1663_v16, %v1663_v16  ;;  %v1667_v20 = vunpack.c.l.b16 %v1658_v50 }
 0x504   : > { %1661 = vrot.lane.b32.xlu2 %v1660_v18, %s2521_s2 }
 0x505   : > { %1665 = vrot.lane.b32.xlu1 %v1664_v19, %s2522_s16  ;;  %v1668_v17 = vpack.c.b16 %v1667_v20, %v1667_v20 }
 0x507   : > { %1669 = vrot.lane.b32.xlu0 %v1668_v17, %s2523_s15 }
 0x55e   : > { %v1662_v24 = vpop.permute.xlu2 %1661 }
 0x55f   : > { %v1673_v26 = vsel %vm1300_vm4, %v1649_v9, %v1662_v24 }
 0x577   : > { %v1666_v52 = vpop.permute.xlu1 %1665 }
 0x578   : > { %v1675_v3 = vsel %vm1396_vm6, %v1673_v26, %v1666_v52 }
 0x579   : > { %v1670_v27 = vpop.permute.xlu0 %1669 }
 0x57a   : > { %v1678_v28 = vsel %vm1676_vm7, %v1675_v3, %v1670_v27 }
 0x57b   : > { %2161 = vmatmul.msk.bf16.vlgmr.msra.gmra.mxu1 %vm1147_vm3, %v1678_v28 }
 0x5f8   : > { %v1707_v30 = vpop.f32.mrf.mxu1 }
 0x5f9   : > { %v1708_v31 = vadd.f32 %v1707_v30, %v1683_v29 }
 0x5fb   : > { %v1711_v32 = vadd.f32 %v1708_v31, %v2944_v46 }
 0x5fd   : > { %v1712_v23 = vsel %vm1147_vm3, %v1711_v32, 0.0 }
 0x5fe   : > { %1713 = vadd.xlane.f32.xlu2 %v1712_v23 }
 0x600   : > { %v1709_v15 = vpop.f32.mrf.mxu1 }
 0x671   : > { %v1714_v41 = vpop.xlane.xlu2 %1713 }
 0x672   : > { %v1722_v42 = vmul.f32 %v1721_v34, %v1714_v41 }
 0x674   : > { %v1723_v43 = vsub.f32 %v1711_v32, %v1722_v42 }
 0x676   : > { %v1724_v51 = vmul.f32 %v1723_v43, %v1723_v43 }
 0x678   : > { %v1725_v44 = vsel %vm1147_vm3, %v1724_v51, 0.0 }
 0x679   : > { %1726 = vadd.xlane.f32.xlu1 %v1725_v44 }
 0x6ec   : > { %v1727_v46 = vpop.xlane.xlu1 %1726 }
 0x6ed   : > { %v1728_v45 = vmul.f32 %v1727_v46, %v1721_v34 }
 0x6ef   : > { %v1729_v47 = vadd.f32 1e-05, %v1728_v45 }
 0x6f1   : > { %2374 = vrsqrt.f32 %v1729_v47  ;;  %vm1736_vm10 = vweird.f32 %v1729_v47 }
 0x6f7   : > { %v2375_v53 = vpop.eup %2374 }
 0x6f8   : > { %v1731_v25 = vmul.f32 %v2375_v53, %v1729_v47  ;;  %vm1737_vm9 = vweird.f32 %v2375_v53 }
 0x6f9   : > { %vm1738_vm11 = vmor %vm1736_vm10, %vm1737_vm9 }
 0x6fa   : > { %v1732_v57 = vmul.f32 %v2375_v53, %v1731_v25 }
 0x6fc   : > { %v1733_v54 = vmul.f32 0.5, %v1732_v57 }
 0x6fe   : > { %v1734_v55 = vsub.f32 1.5, %v1733_v54 }
 0x700   : > { %v1735_v56 = vmul.f32 %v2375_v53, %v1734_v55 }
 0x702   : > { %v1739_v59 = vsel %vm1738_vm11, %v2375_v53, %v1735_v56 }
 0x703   : > { %v1740_v1 = vmul.f32 %v1739_v59, %v1723_v43 }
 0x705   : > { %v1742_v60 = vmul.f32 %v1741_v58, %v1740_v1 }
 0x707   : > { %v1744_v62 = vadd.f32 %v1743_v61, %v1742_v60 }
 0x709   : > { %1745 = vst.msk [vmem:[#allocation4] sm:$0xff] %vm1147_vm3, %v1744_v62 }
 0x70a PF: > { %v2228_v63 = vld [vmem:[%s443_s10 + $0x8] sm:$0xff]  ;;  %v2227_v48 = vld [vmem:[%s443_s10] sm:$0xff]  ;;  %vm1769_vm12 = vcmask 261120   ;;  %p2203_p0 = scmp.ne.s32.totalorder %s2484_s18, 1 }
 0x70b   : > { %v2236_v0 = vld [vmem:[%s2731_s27 + $0x38] sm:$0xff]  ;;  %1779 = vmatpush.bf16.msra.mxu0 %v2228_v63  ;;  %v2235_v5 = vld [vmem:[%s2731_s27 + $0x30] sm:$0xff]  ;;  %v2234_v6 = vld [vmem:[%s2731_s27 + $0x28] sm:$0xff]  ;;  %s3196_s17 = sld [smem:[#allocation24_spill]] (!%p2203_p0) }
 0x70c   : > { %1853 = vmatpush.bf16.msra.mxu1 %v2236_v0  ;;  %v2233_v7 = vld [vmem:[%s2731_s27 + $0x20] sm:$0xff]  ;;  %v2232_v8 = vld [vmem:[%s2731_s27 + $0x18] sm:$0xff]  ;;  %v2231_v2 = vld [vmem:[%s2731_s27 + $0x10] sm:$0xff] }
 0x70d   : > { %v2230_v9 = vld [vmem:[%s2731_s27 + $0x8] sm:$0xff]  ;;  %v2229_v10 = vld [vmem:[%s2731_s27] sm:$0xff] }
 0x70e   : > { %v2376_v11 = vld [vmem:[%s514_s26] ss:$0 sm:$0xff]  ;;  %v1788_v50 = vld [vmem:[#allocation5] sm:$0xff] }
 0x70f   : > { %1780 = vmatpush.bf16.msra.mxu0 %v2227_v48 }
 0x710   : > { %v1747_v4 = vld [vmem:[#allocation4] sm:$0xff]  ;;  %1854 = vmatpush.bf16.msra.mxu1 %v2235_v5 }
 0x711   : > { %v1748_v37 = vpack.c.bf16 %v1747_v4, %v1747_v4 }
 0x713   : > { %2170 = vmatmul.msk.bf16.vlgmr.msra.gmra.mxu0 %vm1769_vm12, %v1748_v37 }
 0x714   : > { %1855 = vmatpush.bf16.msra.mxu1 %v2234_v6 }
 0x718   : > { %1856 = vmatpush.bf16.msra.mxu1 %v2233_v7 }
 0x71c   : > { %1857 = vmatpush.bf16.msra.mxu1 %v2232_v8 }
 0x720   : > { %1858 = vmatpush.bf16.msra.mxu1 %v2231_v2 }
 0x724   : > { %1859 = vmatpush.bf16.msra.mxu1 %v2230_v9 }
 0x728   : > { %1860 = vmatpush.bf16.msra.mxu1 %v2229_v10 }
 0x790   : > { %v1782_v12 = vpop.f32.mrf.mxu0 }
 0x791   : > { %v1783_v13 = vadd.f32 %v2376_v11, %v1782_v12 }
 0x793   : > { %v1786_v49 = vmax.f32 %v1783_v13, 0.0 }
 0x795   : > { %v1787_v14 = vpack.c.bf16 %v1786_v49, %v1786_v49 }
 0x797   : > { %1861 = vmatmul.bf16.vlgmr.msra.gmra.mxu1 %v1787_v14 }
 0x798   : > { %v1784_v16 = vpop.f32.mrf.mxu0 }
 0x814   : > { %v1862_v18 = vpop.f32.mrf.mxu1 }
 0x815   : > { %v1866_v19 = vadd.f32 %v1862_v18, %v1788_v50 }
 0x817   : > { %1867 = vst.msk [vmem:[#allocation5] sm:$0xff] %vm1769_vm12, %v1866_v19 }
 0x818   : > { %1871 = sbr.rel (%p2203_p0) target bundleno = 2352 (0x930), region = 113 }
 0x81c   : > { %v1864_v20 = vpop.f32.mrf.mxu1 }
 0x81d   : > { %v1872_v17 = vld [vmem:[%s3196_s17] sm:$0xff]  ;;  %v2525_v27 = vmov 32.0   ;;  %v2377_v53 = vld [vmem:[%s3196_s17 + $0x8] ss:$0 sm:$0xff] }
 0x81e   : > { %v1874_v21 = vld [vmem:[#allocation4] sm:$0xff]  ;;  %v1875_v22 = vld [vmem:[#allocation5] sm:$0xff]  ;;  %v1877_v26 = vperm.slane %v1872_v17, 4  ;;  %2378 = vrcp.f32 %v2525_v27  ;;  %v1908_v45 = vperm.slane %v1872_v17, 7 }
 0x81f   : > { %v1876_v24 = vadd.f32 %v1875_v22, %v1874_v21 }
 0x821   : > { %v1878_v52 = vadd.f32 %v1877_v26, %v1876_v24 }
 0x823   : > { %v1879_v3 = vsel %vm1769_vm12, %v1878_v52, 0.0 }
 0x824   : > { %1880 = vadd.xlane.f32.xlu0 %v1879_v3  ;;  %v2379_v28 = vpop.eup %2378 }
 0x825   : > { %v1883_v29 = vmul.f32 32.0, %v2379_v28  ;;  %vm1887_vm13 = vweird.f32 %v2379_v28 }
 0x827   : > { %v1884_v30 = vsub.f32 1.0, %v1883_v29 }
 0x829   : > { %v1885_v31 = vmul.f32 %v2379_v28, %v1884_v30 }
 0x82b   : > { %v1886_v32 = vadd.f32 %v2379_v28, %v1885_v31 }
 0x82d   : > { %v1888_v23 = vsel %vm1887_vm13, %v2379_v28, %v1886_v32 }
 0x897   : > { %v1881_v15 = vpop.xlane.xlu0 %1880 }
 0x898   : > { %v1889_v33 = vmul.f32 %v1888_v23, %v1881_v15 }
 0x89a   : > { %v1890_v35 = vsub.f32 %v1878_v52, %v1889_v33 }
 0x89c   : > { %v1891_v36 = vmul.f32 %v1890_v35, %v1890_v35 }
 0x89e   : > { %v1892_v38 = vsel %vm1769_vm12, %v1891_v36, 0.0 }
 0x89f   : > { %1893 = vadd.xlane.f32.xlu0 %v1892_v38 }
 0x912   : > { %v1894_v39 = vpop.xlane.xlu0 %1893 }
 0x913   : > { %v1895_v40 = vmul.f32 %v1894_v39, %v1888_v23 }
 0x915   : > { %v1896_v34 = vadd.f32 1e-05, %v1895_v40 }
 0x917   : > { %2380 = vrsqrt.f32 %v1896_v34  ;;  %vm1903_vm15 = vweird.f32 %v1896_v34 }
 0x91d   : > { %v2381_v41 = vpop.eup %2380 }
 0x91e   : > { %v1898_v42 = vmul.f32 %v2381_v41, %v1896_v34  ;;  %vm1904_vm14 = vweird.f32 %v2381_v41 }
 0x91f   : > { %vm1905_vm0 = vmor %vm1903_vm15, %vm1904_vm14 }
 0x920   : > { %v1899_v43 = vmul.f32 %v2381_v41, %v1898_v42 }
 0x922   : > { %v1900_v51 = vmul.f32 0.5, %v1899_v43 }
 0x924   : > { %v1901_v44 = vsub.f32 1.5, %v1900_v51 }
 0x926   : > { %v1902_v46 = vmul.f32 %v2381_v41, %v1901_v44 }
 0x928   : > { %v1906_v47 = vsel %vm1905_vm0, %v2381_v41, %v1902_v46 }
 0x929   : > { %v1907_v25 = vmul.f32 %v1906_v47, %v1890_v35 }
 0x92b   : > { %v1909_v57 = vmul.f32 %v1908_v45, %v1907_v25 }
 0x92d   : > { %v1911_v54 = vadd.f32 %v2377_v53, %v1909_v57 }
 0x92f   : > { %1912 = vst.msk [vmem:[%s498_s21] sm:$0xff] %vm1769_vm12, %v1911_v54 }
 0x930 PF: > { %s2205_s26 = sshll.u32 %s2492_s20, 1  ;;  %s1928_s2 = sshll.u32 %s498_s21, 4  ;;  %s1929_s2 = int_to_ptr.vmem [resolvable:$true] %s1928_s2 }
 0x931   : > { %s1924_s6 = sadd.s32 %s2488_s19, %s2205_s26  ;;  %s3197_s5 = sld [smem:[#allocation26_spill]] }
 0x932   : > { %s2206_s16 = sshll.u32 %s1924_s6, 3  ;;  %s3198_s23 = sand.u32 1, %s2468_s14  }
 0x933   : > { %s1914_s10 = scalar_lea.sflag [#allocation8], %s3198_s23 }
 0x937   : > { %s1926_s22 = scalar_lea.hbm %s3197_s5, %s2206_s16  ;;  %s2402_s12 = scalar_lea.hbm %s3197_s5, 32 }
 0x938   : > { %s1930_s0 = sshll.u32 %s1926_s22, 4  ;;  %s1931_s0 = int_to_ptr.hbm [resolvable:$true] %s1930_s0 }
 0x939   : > { %s2396_s27 = sshra.s32 %s1931_s0, 4  ;;  %s2397_s27 = int_to_ptr.hbm [resolvable:$true] %s2396_s27 }
 0x93a   : > { %s2398_s29 = scalar_lea.hbm %s2397_s27, 8  ;;  %p2403_p4 = scmp.lt.s32.totalorder %s2397_s27, %s3197_s5 }
 0x93b   : > { %p2399_p1 = scmp.ne.s32.totalorder %s2397_s27, %s2398_s29  ;;  %p2404_p5 = scmp.lt.s32.totalorder %s2402_s12, %s2398_s29 }
 0x93d   : > { %p2400_p2 = pnand %p2399_p1, %p2671_p9  ;;  %p2405_p6 = por %p2404_p5, %p2403_p4 }
 0x93f   : > { %p2401_p3 = pneg %p2400_p2 }
 0x941   : > { %p2406_p7 = pnand %p2405_p6, %p2401_p3 }
 0x943   : > { %2409 = shalt.err (!%p2406_p7)
}
 0x944   : > { %2237 = dma.vmem_to_hbm [thread:$0]  (%p2671_p9), %s1929_s2, 128, %s1931_s0, %s1914_s10  }
 0x945 PF: > { %p2243_p8 = scmp.ge.s32.totalorder %s2508_s24, 2  ;;  %s1942_s28 = sand.u32 1, %s2464_s13  }
 0x946   : > { %s1943_s26 = scalar_lea.sflag [#allocation8], %s1942_s28 }
 0x947   : > { %p2240_p10 = pnand %p2243_p8, %p2680_p13 }
 0x949   : > { %p2241_p11 = pneg %p2240_p10 }
 0x94b   : > { %2459 = dma.done.wait (%p2241_p11), %s1943_s26, 128  }
 0x94c   : > { %2461 = vsyncadd (%p2241_p11), %s1943_s26, 4294967168  ;;  %s23_s24 = sadd.s32 1, %s2508_s24   ;;  %s3200_s6 = sld [smem:[#allocation10_spill]] }
 0x94d   : > { %p20_p12 = scmp.ge.s32.totalorder %s23_s24, 10   ;;  %s3201_s15 = sld [smem:[#allocation20_spill]] }
 0x94e   : > { %s3202_s16 = sld [smem:[#allocation11_spill]]  ;;  %s3210_s13 = smov %s2468_s14 }
 0x94f   : > { %s3203_s17 = sld [smem:[#allocation17_spill]] }
 0x950   : > { %s3204_s18 = sld [smem:[#allocation12_spill]] }
 0x951   : > { %s3205_s19 = sld [smem:[#allocation13_spill]]  ;;  %22 = sbr.rel (!%p20_p12) target bundleno = 14 (0xe), region = 165 }
 0x952   : > { %s3206_s20 = sld [smem:[#allocation14_spill]]  ;;  %s3211_s14 = smov %s3200_s6 }
 0x953   : > { %s3207_s21 = sld [smem:[#allocation15_spill]] }
 0x954   : > { %s3208_s22 = sld [smem:[#allocation16_spill]] }
 0x955   : > { %s3209_s23 = sld [smem:[#allocation18_spill]] }
 0x956   :  { %1949 = vsyncpa [#allocation8], 1 }
 0x957   :  { %1951 = vsyncpa [#allocation8 + $0x1], 1 }

</bundles_post_ra>
